<compile_context>
chip_gen: v7x
topology: tpu7x:2x2x1
jax: 0.10.0
libtpu: 0.0.40
codegen_flags: <defaults>
</compile_context>

<pallas_src>
import functools

import jax
import jax.numpy as jnp
from jax.experimental import pallas as pl
from jax.experimental.pallas import tpu as pltpu


def _round_up(x, m):
    return ((x + m - 1) // m) * m


def _vmem_limit_bytes():
    # Budget against the actual device instead of a hard-coded constant.
    try:
        cap = pltpu.get_tpu_info().vmem_capacity_bytes
    except Exception:
        cap = 64 * 1024 * 1024
    return int(min(cap * 3 // 4, 96 * 1024 * 1024))


def _pick_toh(oh, ow, target_rows=2048):
    """Output-row tile height: whole image if small, else the largest divisor of OH
    whose tile has at most ~target_rows output positions."""
    if oh * ow <= target_rows or ow > target_rows:
        return oh
    best = 1
    for t in range(1, oh + 1):
        if oh % t == 0 and t * ow <= target_rows:
            best = t
    return best


# ----------------------------- Pallas kernel --------------------------------
def _conv_block_kernel(x_ref, w_ref, shift_ref, o_ref, *, kh, kw, stride, toh, ow,
                       cin, cout):
    # x_ref:     (s*s, Hph, Wph, Cin) bf16 -- stride-phase-split padded image (one batch elem)
    # w_ref:     (kh*kw, Cin, Cout)   bf16 -- BN-scale-folded conv weights (VMEM resident)
    # shift_ref: (1, Cout)            f32  -- folded conv-bias + BN shift
    # o_ref:     (1, TOH, OW, Cout)        -- output tile (bf16 mid-stack, f32 final layer)
    t = pl.program_id(1)
    oh0 = t * toh
    m = toh * ow

    acc = jnp.zeros((m, cout), jnp.float32)
    # Unrolled tap loop: im2col fused into the kernel (no HBM patch matrix).
    for i in range(kh):
        for j in range(kw):
            phase = (i % stride) * stride + (j % stride)
            tap = x_ref[phase,
                        pl.ds(oh0 + i // stride, toh),
                        pl.ds(j // stride, ow), :]            # (TOH, OW, Cin)
            acc += jnp.dot(tap.reshape(m, cin), w_ref[i * kw + j],
                           preferred_element_type=jnp.float32)

    y = jnp.maximum(acc + shift_ref[...], 0.0)                 # bias/BN shift + ReLU
    o_ref[...] = y.reshape(1, toh, ow, cout).astype(o_ref.dtype)


# ------------------------------- per-block wrapper ---------------------------
def conv_block_forward_nhwc(x_nhwc, params, *, stride, padding, eps=1e-5,
                            out_dtype=jnp.bfloat16):
    """One ConvBlock: Conv2d(bias) -> BatchNorm2d(eval) -> ReLU.  NHWC in/out."""
    w, b, gamma, beta, rmean, rvar = (params["w"], params["b"], params["gamma"],
                                      params["beta"], params["rmean"], params["rvar"])
    cout, cin, kh, kw = w.shape
    n, h, wd, cin_x = x_nhwc.shape
    assert cin_x == cin
    s = stride

    hp, wp = h + 2 * padding, wd + 2 * padding
    oh = (hp - kh) // s + 1
    ow = (wp - kw) // s + 1

    # Spatial zero-pad, extended on the bottom/right so H/W divide the stride (makes
    # the phase split a pure reshape); the extra zero rows/cols are never read.
    hp2 = max(_round_up(hp, s), s * (oh + (kh - 1) // s))
    wp2 = max(_round_up(wp, s), s * (ow + (kw - 1) // s))
    x_pad = jnp.pad(x_nhwc.astype(jnp.bfloat16),
                    ((0, 0), (padding, hp2 - h - padding),
                     (padding, wp2 - wd - padding), (0, 0)))
    hph, wph = hp2 // s, wp2 // s
    # Stride-phase split (space-to-depth); fuses with the pad into one XLA pass so
    # every in-kernel tap gather becomes a unit-stride slice.
    x_ph = (x_pad.reshape(n, hph, s, wph, s, cin)
                 .transpose(0, 2, 4, 1, 3, 5)
                 .reshape(n * s * s, hph, wph, cin))

    # Fold BN (eval) scale into the weights; conv bias + BN shift into one vector.
    scale = gamma / jnp.sqrt(rvar + eps)
    shift = (beta - rmean * scale + b * scale).astype(jnp.float32).reshape(1, cout)
    w_f = jnp.transpose(w, (2, 3, 1, 0)).reshape(kh * kw, cin, cout)   # (tap, cin, cout)
    w_f = (w_f * scale[None, None, :]).astype(jnp.bfloat16)

    toh = _pick_toh(oh, ow)
    grid = (n, oh // toh)
    kernel = functools.partial(_conv_block_kernel, kh=kh, kw=kw, stride=s, toh=toh,
                               ow=ow, cin=cin, cout=cout)

    return pl.pallas_call(
        kernel,
        out_shape=jax.ShapeDtypeStruct((n, oh, ow, cout), out_dtype),
        grid_spec=pltpu.PrefetchScalarGridSpec(
            num_scalar_prefetch=0,
            grid=grid,
            in_specs=[
                # one image's s*s phase planes per grid step
                pl.BlockSpec((s * s, hph, wph, cin), lambda bi, ti: (bi, 0, 0, 0)),
                # weights + shift: constant block index -> DMA'd once, VMEM resident
                pl.BlockSpec((kh * kw, cin, cout), lambda bi, ti: (0, 0, 0)),
                pl.BlockSpec((1, cout), lambda bi, ti: (0, 0)),
            ],
            out_specs=pl.BlockSpec((1, toh, ow, cout), lambda bi, ti: (bi, ti, 0, 0)),
        ),
        compiler_params=pltpu.CompilerParams(
            dimension_semantics=("parallel", "parallel"),
            vmem_limit_bytes=_vmem_limit_bytes(),
        ),
    )(x_ph, w_f, shift)


# ------------------------------- ConvSeq wrapper -----------------------------
def make_conv_seq_params(key, in_channels, out_channellist, kernel_sizelist):
    """Deterministic synthetic parameters for each ConvBlock."""
    params = []
    cin = in_channels
    for i, (cout, ksz) in enumerate(zip(out_channellist, kernel_sizelist)):
        k = jax.random.fold_in(key, i)
        kw_, kb_, kg_, kbeta_, km_, kv_ = jax.random.split(k, 6)
        params.append({
            "w": 0.1 * jax.random.normal(kw_, (cout, cin, ksz, ksz), jnp.float32),
            "b": 0.05 * jax.random.normal(kb_, (cout,), jnp.float32),
            "gamma": 1.0 + 0.1 * jax.random.normal(kg_, (cout,), jnp.float32),
            "beta": 0.1 * jax.random.normal(kbeta_, (cout,), jnp.float32),
            "rmean": 0.05 * jax.random.normal(km_, (cout,), jnp.float32),
            "rvar": 1.0 + 0.1 * jax.random.uniform(kv_, (cout,), jnp.float32),
        })
        cin = cout
    return params


def conv_seq_forward(x_nchw, params, stridelist, paddinglist):
    # NHWC across all layers (one transpose in, one out); bf16 activations between
    # layers, f32 only for the final layer's output.
    x = jnp.transpose(x_nchw, (0, 2, 3, 1))
    last = len(params) - 1
    for idx, (p, s, pad) in enumerate(zip(params, stridelist, paddinglist)):
        x = conv_block_forward_nhwc(
            x, p, stride=s, padding=pad,
            out_dtype=jnp.float32 if idx == last else jnp.bfloat16)
    return jnp.transpose(x, (0, 3, 1, 2))   # back to NCHW, f32


# ------------------------- pure-JAX reference (check) ------------------------
def _ref_conv_block(x, p, stride, padding, eps=1e-5):
    y = jax.lax.conv_general_dilated(
        x, p["w"], window_strides=(stride, stride),
        padding=[(padding, padding), (padding, padding)],
        dimension_numbers=("NCHW", "OIHW", "NCHW"))
    y = y + p["b"][None, :, None, None]
    scale = p["gamma"] / jnp.sqrt(p["rvar"] + eps)
    shift = p["beta"] - p["rmean"] * scale
    y = y * scale[None, :, None, None] + shift[None, :, None, None]
    return jnp.maximum(y, 0.0)


def _ref_conv_seq(x, params, stridelist, paddinglist):
    for p, s, pad in zip(params, stridelist, paddinglist):
        x = _ref_conv_block(x, p, s, pad)
    return x


# ----------------------------------- main ------------------------------------
if __name__ == "__main__":
    key = jax.random.PRNGKey(0)
    kx, kp = jax.random.split(key)

    # ConvSeq(in_channels=4, out_channellist=[8, 16], kernel_sizelist=[3, 3],
    #         stridelist=[2, 1], paddinglist=[1, 1], convname="conv")
    in_channels = 4
    out_channellist = [8, 16]
    kernel_sizelist = [3, 3]
    stridelist = [2, 1]
    paddinglist = [1, 1]

    x = jax.random.normal(kx, (2, in_channels, 16, 16), jnp.float32)  # NCHW
    params = make_conv_seq_params(kp, in_channels, out_channellist, kernel_sizelist)

    fwd = jax.jit(functools.partial(conv_seq_forward,
                                    stridelist=stridelist, paddinglist=paddinglist))
    out = fwd(x, params)
    out = jax.block_until_ready(out)

    ref = _ref_conv_seq(x, params, stridelist, paddinglist)
    assert out.shape == ref.shape == (2, 16, 8, 8), out.shape
    assert jnp.allclose(out, ref, atol=2e-2, rtol=2e-2), float(jnp.max(jnp.abs(out - ref)))

    print("KERNEL_OK")
</pallas_src>

<mosaic_0001>
module attributes {stable_mosaic.version = 11 : i64} {
  func.func @_conv_block_kernel(%arg0: i32, %arg1: i32, %arg2: memref<4x9x9x4xbf16, #tpu.memory_space<vmem>>, %arg3: memref<9x4x8xbf16, #tpu.memory_space<vmem>>, %arg4: memref<1x8xf32, #tpu.memory_space<vmem>>, %arg5: memref<1x8x8x8xbf16, #tpu.memory_space<vmem>>) attributes {dimension_semantics = [#tpu.dimension_semantics<parallel>, #tpu.dimension_semantics<parallel>], iteration_bounds = array<i64: 2, 1>, scalar_prefetch = 0 : i64, scratch_operands = 0 : i64, tpu.core_type = #tpu.core_type<tc>, window_params = [{transform_indices = @transform_0, window_bounds = array<i64: 4, 9, 9, 4>}, {pipeline_mode = #tpu.pipeline_mode<synchronous>, transform_indices = @transform_1, window_bounds = array<i64: 9, 4, 8>}, {pipeline_mode = #tpu.pipeline_mode<synchronous>, transform_indices = @transform_2, window_bounds = array<i64: 1, 8>}, {transform_indices = @transform_3, window_bounds = array<i64: 1, 8, 8, 8>}]} {
    %c8_i32 = arith.constant 8 : i32
    %0 = arith.muli %arg1, %c8_i32 : i32
    %cst = arith.constant 0.000000e+00 : f32
    %1 = vector.broadcast %cst : f32 to vector<64x8xf32>
    %c0_i32 = arith.constant 0 : i32
    %2 = arith.addi %0, %c0_i32 : i32
    %c0 = arith.constant 0 : index
    %3 = arith.index_cast %2 : i32 to index
    %c0_0 = arith.constant 0 : index
    %c0_1 = arith.constant 0 : index
    %4 = vector.load %arg2[%c0, %3, %c0_0, %c0_1] : memref<4x9x9x4xbf16, #tpu.memory_space<vmem>>, vector<1x8x8x4xbf16>
    %5 = vector.shape_cast %4 : vector<1x8x8x4xbf16> to vector<8x8x4xbf16>
    %6 = vector.shape_cast %5 : vector<8x8x4xbf16> to vector<64x4xbf16>
    %c0_2 = arith.constant 0 : index
    %c0_3 = arith.constant 0 : index
    %c0_4 = arith.constant 0 : index
    %7 = vector.load %arg3[%c0_2, %c0_3, %c0_4] : memref<9x4x8xbf16, #tpu.memory_space<vmem>>, vector<1x4x8xbf16>
    %8 = vector.shape_cast %7 : vector<1x4x8xbf16> to vector<4x8xbf16>
    %cst_5 = arith.constant dense<0.000000e+00> : vector<64x8xf32>
    %9 = tpu.matmul %6, %8, %cst_5 {dimension_numbers = #tpu.dot_dimension_numbers<[1], [0], [0], [1], [0, 0, 1, 1], [], []>} : vector<64x4xbf16>, vector<4x8xbf16>, vector<64x8xf32> -> vector<64x8xf32>
    %10 = arith.addf %1, %9 : vector<64x8xf32>
    %c0_i32_6 = arith.constant 0 : i32
    %11 = arith.addi %0, %c0_i32_6 : i32
    %c1 = arith.constant 1 : index
    %12 = arith.index_cast %11 : i32 to index
    %c0_7 = arith.constant 0 : index
    %c0_8 = arith.constant 0 : index
    %13 = vector.load %arg2[%c1, %12, %c0_7, %c0_8] : memref<4x9x9x4xbf16, #tpu.memory_space<vmem>>, vector<1x8x8x4xbf16>
    %14 = vector.shape_cast %13 : vector<1x8x8x4xbf16> to vector<8x8x4xbf16>
    %15 = vector.shape_cast %14 : vector<8x8x4xbf16> to vector<64x4xbf16>
    %c1_9 = arith.constant 1 : index
    %c0_10 = arith.constant 0 : index
    %c0_11 = arith.constant 0 : index
    %16 = vector.load %arg3[%c1_9, %c0_10, %c0_11] : memref<9x4x8xbf16, #tpu.memory_space<vmem>>, vector<1x4x8xbf16>
    %17 = vector.shape_cast %16 : vector<1x4x8xbf16> to vector<4x8xbf16>
    %cst_12 = arith.constant dense<0.000000e+00> : vector<64x8xf32>
    %18 = tpu.matmul %15, %17, %cst_12 {dimension_numbers = #tpu.dot_dimension_numbers<[1], [0], [0], [1], [0, 0, 1, 1], [], []>} : vector<64x4xbf16>, vector<4x8xbf16>, vector<64x8xf32> -> vector<64x8xf32>
    %19 = arith.addf %10, %18 : vector<64x8xf32>
    %c0_i32_13 = arith.constant 0 : i32
    %20 = arith.addi %0, %c0_i32_13 : i32
    %c0_14 = arith.constant 0 : index
    %21 = arith.index_cast %20 : i32 to index
    %c1_15 = arith.constant 1 : index
    %c0_16 = arith.constant 0 : index
    %22 = vector.load %arg2[%c0_14, %21, %c1_15, %c0_16] : memref<4x9x9x4xbf16, #tpu.memory_space<vmem>>, vector<1x8x8x4xbf16>
    %23 = vector.shape_cast %22 : vector<1x8x8x4xbf16> to vector<8x8x4xbf16>
    %24 = vector.shape_cast %23 : vector<8x8x4xbf16> to vector<64x4xbf16>
    %c2 = arith.constant 2 : index
    %c0_17 = arith.constant 0 : index
    %c0_18 = arith.constant 0 : index
    %25 = vector.load %arg3[%c2, %c0_17, %c0_18] : memref<9x4x8xbf16, #tpu.memory_space<vmem>>, vector<1x4x8xbf16>
    %26 = vector.shape_cast %25 : vector<1x4x8xbf16> to vector<4x8xbf16>
    %cst_19 = arith.constant dense<0.000000e+00> : vector<64x8xf32>
    %27 = tpu.matmul %24, %26, %cst_19 {dimension_numbers = #tpu.dot_dimension_numbers<[1], [0], [0], [1], [0, 0, 1, 1], [], []>} : vector<64x4xbf16>, vector<4x8xbf16>, vector<64x8xf32> -> vector<64x8xf32>
    %28 = arith.addf %19, %27 : vector<64x8xf32>
    %c0_i32_20 = arith.constant 0 : i32
    %29 = arith.addi %0, %c0_i32_20 : i32
    %c2_21 = arith.constant 2 : index
    %30 = arith.index_cast %29 : i32 to index
    %c0_22 = arith.constant 0 : index
    %c0_23 = arith.constant 0 : index
    %31 = vector.load %arg2[%c2_21, %30, %c0_22, %c0_23] : memref<4x9x9x4xbf16, #tpu.memory_space<vmem>>, vector<1x8x8x4xbf16>
    %32 = vector.shape_cast %31 : vector<1x8x8x4xbf16> to vector<8x8x4xbf16>
    %33 = vector.shape_cast %32 : vector<8x8x4xbf16> to vector<64x4xbf16>
    %c3 = arith.constant 3 : index
    %c0_24 = arith.constant 0 : index
    %c0_25 = arith.constant 0 : index
    %34 = vector.load %arg3[%c3, %c0_24, %c0_25] : memref<9x4x8xbf16, #tpu.memory_space<vmem>>, vector<1x4x8xbf16>
    %35 = vector.shape_cast %34 : vector<1x4x8xbf16> to vector<4x8xbf16>
    %cst_26 = arith.constant dense<0.000000e+00> : vector<64x8xf32>
    %36 = tpu.matmul %33, %35, %cst_26 {dimension_numbers = #tpu.dot_dimension_numbers<[1], [0], [0], [1], [0, 0, 1, 1], [], []>} : vector<64x4xbf16>, vector<4x8xbf16>, vector<64x8xf32> -> vector<64x8xf32>
    %37 = arith.addf %28, %36 : vector<64x8xf32>
    %c0_i32_27 = arith.constant 0 : i32
    %38 = arith.addi %0, %c0_i32_27 : i32
    %c3_28 = arith.constant 3 : index
    %39 = arith.index_cast %38 : i32 to index
    %c0_29 = arith.constant 0 : index
    %c0_30 = arith.constant 0 : index
    %40 = vector.load %arg2[%c3_28, %39, %c0_29, %c0_30] : memref<4x9x9x4xbf16, #tpu.memory_space<vmem>>, vector<1x8x8x4xbf16>
    %41 = vector.shape_cast %40 : vector<1x8x8x4xbf16> to vector<8x8x4xbf16>
    %42 = vector.shape_cast %41 : vector<8x8x4xbf16> to vector<64x4xbf16>
    %c4 = arith.constant 4 : index
    %c0_31 = arith.constant 0 : index
    %c0_32 = arith.constant 0 : index
    %43 = vector.load %arg3[%c4, %c0_31, %c0_32] : memref<9x4x8xbf16, #tpu.memory_space<vmem>>, vector<1x4x8xbf16>
    %44 = vector.shape_cast %43 : vector<1x4x8xbf16> to vector<4x8xbf16>
    %cst_33 = arith.constant dense<0.000000e+00> : vector<64x8xf32>
    %45 = tpu.matmul %42, %44, %cst_33 {dimension_numbers = #tpu.dot_dimension_numbers<[1], [0], [0], [1], [0, 0, 1, 1], [], []>} : vector<64x4xbf16>, vector<4x8xbf16>, vector<64x8xf32> -> vector<64x8xf32>
    %46 = arith.addf %37, %45 : vector<64x8xf32>
    %c0_i32_34 = arith.constant 0 : i32
    %47 = arith.addi %0, %c0_i32_34 : i32
    %c2_35 = arith.constant 2 : index
    %48 = arith.index_cast %47 : i32 to index
    %c1_36 = arith.constant 1 : index
    %c0_37 = arith.constant 0 : index
    %49 = vector.load %arg2[%c2_35, %48, %c1_36, %c0_37] : memref<4x9x9x4xbf16, #tpu.memory_space<vmem>>, vector<1x8x8x4xbf16>
    %50 = vector.shape_cast %49 : vector<1x8x8x4xbf16> to vector<8x8x4xbf16>
    %51 = vector.shape_cast %50 : vector<8x8x4xbf16> to vector<64x4xbf16>
    %c5 = arith.constant 5 : index
    %c0_38 = arith.constant 0 : index
    %c0_39 = arith.constant 0 : index
    %52 = vector.load %arg3[%c5, %c0_38, %c0_39] : memref<9x4x8xbf16, #tpu.memory_space<vmem>>, vector<1x4x8xbf16>
    %53 = vector.shape_cast %52 : vector<1x4x8xbf16> to vector<4x8xbf16>
    %cst_40 = arith.constant dense<0.000000e+00> : vector<64x8xf32>
    %54 = tpu.matmul %51, %53, %cst_40 {dimension_numbers = #tpu.dot_dimension_numbers<[1], [0], [0], [1], [0, 0, 1, 1], [], []>} : vector<64x4xbf16>, vector<4x8xbf16>, vector<64x8xf32> -> vector<64x8xf32>
    %55 = arith.addf %46, %54 : vector<64x8xf32>
    %c1_i32 = arith.constant 1 : i32
    %56 = arith.addi %0, %c1_i32 : i32
    %c0_41 = arith.constant 0 : index
    %57 = arith.index_cast %56 : i32 to index
    %c0_42 = arith.constant 0 : index
    %c0_43 = arith.constant 0 : index
    %58 = vector.load %arg2[%c0_41, %57, %c0_42, %c0_43] : memref<4x9x9x4xbf16, #tpu.memory_space<vmem>>, vector<1x8x8x4xbf16>
    %59 = vector.shape_cast %58 : vector<1x8x8x4xbf16> to vector<8x8x4xbf16>
    %60 = vector.shape_cast %59 : vector<8x8x4xbf16> to vector<64x4xbf16>
    %c6 = arith.constant 6 : index
    %c0_44 = arith.constant 0 : index
    %c0_45 = arith.constant 0 : index
    %61 = vector.load %arg3[%c6, %c0_44, %c0_45] : memref<9x4x8xbf16, #tpu.memory_space<vmem>>, vector<1x4x8xbf16>
    %62 = vector.shape_cast %61 : vector<1x4x8xbf16> to vector<4x8xbf16>
    %cst_46 = arith.constant dense<0.000000e+00> : vector<64x8xf32>
    %63 = tpu.matmul %60, %62, %cst_46 {dimension_numbers = #tpu.dot_dimension_numbers<[1], [0], [0], [1], [0, 0, 1, 1], [], []>} : vector<64x4xbf16>, vector<4x8xbf16>, vector<64x8xf32> -> vector<64x8xf32>
    %64 = arith.addf %55, %63 : vector<64x8xf32>
    %c1_i32_47 = arith.constant 1 : i32
    %65 = arith.addi %0, %c1_i32_47 : i32
    %c1_48 = arith.constant 1 : index
    %66 = arith.index_cast %65 : i32 to index
    %c0_49 = arith.constant 0 : index
    %c0_50 = arith.constant 0 : index
    %67 = vector.load %arg2[%c1_48, %66, %c0_49, %c0_50] : memref<4x9x9x4xbf16, #tpu.memory_space<vmem>>, vector<1x8x8x4xbf16>
    %68 = vector.shape_cast %67 : vector<1x8x8x4xbf16> to vector<8x8x4xbf16>
    %69 = vector.shape_cast %68 : vector<8x8x4xbf16> to vector<64x4xbf16>
    %c7 = arith.constant 7 : index
    %c0_51 = arith.constant 0 : index
    %c0_52 = arith.constant 0 : index
    %70 = vector.load %arg3[%c7, %c0_51, %c0_52] : memref<9x4x8xbf16, #tpu.memory_space<vmem>>, vector<1x4x8xbf16>
    %71 = vector.shape_cast %70 : vector<1x4x8xbf16> to vector<4x8xbf16>
    %cst_53 = arith.constant dense<0.000000e+00> : vector<64x8xf32>
    %72 = tpu.matmul %69, %71, %cst_53 {dimension_numbers = #tpu.dot_dimension_numbers<[1], [0], [0], [1], [0, 0, 1, 1], [], []>} : vector<64x4xbf16>, vector<4x8xbf16>, vector<64x8xf32> -> vector<64x8xf32>
    %73 = arith.addf %64, %72 : vector<64x8xf32>
    %c1_i32_54 = arith.constant 1 : i32
    %74 = arith.addi %0, %c1_i32_54 : i32
    %c0_55 = arith.constant 0 : index
    %75 = arith.index_cast %74 : i32 to index
    %c1_56 = arith.constant 1 : index
    %c0_57 = arith.constant 0 : index
    %76 = vector.load %arg2[%c0_55, %75, %c1_56, %c0_57] : memref<4x9x9x4xbf16, #tpu.memory_space<vmem>>, vector<1x8x8x4xbf16>
    %77 = vector.shape_cast %76 : vector<1x8x8x4xbf16> to vector<8x8x4xbf16>
    %78 = vector.shape_cast %77 : vector<8x8x4xbf16> to vector<64x4xbf16>
    %c8 = arith.constant 8 : index
    %c0_58 = arith.constant 0 : index
    %c0_59 = arith.constant 0 : index
    %79 = vector.load %arg3[%c8, %c0_58, %c0_59] : memref<9x4x8xbf16, #tpu.memory_space<vmem>>, vector<1x4x8xbf16>
    %80 = vector.shape_cast %79 : vector<1x4x8xbf16> to vector<4x8xbf16>
    %cst_60 = arith.constant dense<0.000000e+00> : vector<64x8xf32>
    %81 = tpu.matmul %78, %80, %cst_60 {dimension_numbers = #tpu.dot_dimension_numbers<[1], [0], [0], [1], [0, 0, 1, 1], [], []>} : vector<64x4xbf16>, vector<4x8xbf16>, vector<64x8xf32> -> vector<64x8xf32>
    %82 = arith.addf %73, %81 : vector<64x8xf32>
    %c0_61 = arith.constant 0 : index
    %c0_62 = arith.constant 0 : index
    %83 = vector.load %arg4[%c0_61, %c0_62] : memref<1x8xf32, #tpu.memory_space<vmem>>, vector<1x8xf32>
    %84 = vector.broadcast %83 : vector<1x8xf32> to vector<64x8xf32>
    %85 = arith.addf %82, %84 : vector<64x8xf32>
    %cst_63 = arith.constant 0.000000e+00 : f32
    %86 = vector.broadcast %cst_63 : f32 to vector<64x8xf32>
    %87 = arith.maximumf %85, %86 : vector<64x8xf32>
    %88 = vector.shape_cast %87 : vector<64x8xf32> to vector<1x8x8x8xf32>
    %89 = arith.truncf %88 : vector<1x8x8x8xf32> to vector<1x8x8x8xbf16>
    %c0_64 = arith.constant 0 : index
    %c0_65 = arith.constant 0 : index
    %c0_66 = arith.constant 0 : index
    %c0_67 = arith.constant 0 : index
    %90 = vector.load %arg5[%c0_64, %c0_65, %c0_66, %c0_67] : memref<1x8x8x8xbf16, #tpu.memory_space<vmem>>, vector<1x8x8x8xbf16>
    tpu.vector_store %arg5[%c0_64, %c0_65, %c0_66, %c0_67], %89 {strides = array<i32>} : memref<1x8x8x8xbf16, #tpu.memory_space<vmem>>, vector<1x8x8x8xbf16>,
    return
  }
  func.func @transform_0(%arg0: i32, %arg1: i32) -> (i32, i32, i32, i32) {
    %c0_i32 = arith.constant 0 : i32
    %c0_i32_0 = arith.constant 0 : i32
    %c0_i32_1 = arith.constant 0 : i32
    %c0_i32_2 = arith.constant 0 : i32
    return %arg0, %c0_i32, %c0_i32_0, %c0_i32_1 : i32, i32, i32, i32
  }
  func.func @transform_1(%arg0: i32, %arg1: i32) -> (i32, i32, i32) {
    %c0_i32 = arith.constant 0 : i32
    %c0_i32_0 = arith.constant 0 : i32
    %c0_i32_1 = arith.constant 0 : i32
    %c0_i32_2 = arith.constant 0 : i32
    return %c0_i32, %c0_i32_0, %c0_i32_1 : i32, i32, i32
  }
  func.func @transform_2(%arg0: i32, %arg1: i32) -> (i32, i32) {
    %c0_i32 = arith.constant 0 : i32
    %c0_i32_0 = arith.constant 0 : i32
    %c0_i32_1 = arith.constant 0 : i32
    return %c0_i32, %c0_i32_0 : i32, i32
  }
  func.func @transform_3(%arg0: i32, %arg1: i32) -> (i32, i32, i32, i32) {
    %c0_i32 = arith.constant 0 : i32
    %c0_i32_0 = arith.constant 0 : i32
    %c0_i32_1 = arith.constant 0 : i32
    return %arg0, %arg1, %c0_i32, %c0_i32_0 : i32, i32, i32, i32
  }
}

module attributes {stable_mosaic.version = 11 : i64} {
  func.func @_conv_block_kernel(%arg0: i32, %arg1: i32, %arg2: memref<1x10x10x8xbf16, #tpu.memory_space<vmem>>, %arg3: memref<9x8x16xbf16, #tpu.memory_space<vmem>>, %arg4: memref<1x16xf32, #tpu.memory_space<vmem>>, %arg5: memref<1x8x8x16xf32, #tpu.memory_space<vmem>>) attributes {dimension_semantics = [#tpu.dimension_semantics<parallel>, #tpu.dimension_semantics<parallel>], iteration_bounds = array<i64: 2, 1>, scalar_prefetch = 0 : i64, scratch_operands = 0 : i64, tpu.core_type = #tpu.core_type<tc>, window_params = [{transform_indices = @transform_0, window_bounds = array<i64: 1, 10, 10, 8>}, {pipeline_mode = #tpu.pipeline_mode<synchronous>, transform_indices = @transform_1, window_bounds = array<i64: 9, 8, 16>}, {pipeline_mode = #tpu.pipeline_mode<synchronous>, transform_indices = @transform_2, window_bounds = array<i64: 1, 16>}, {transform_indices = @transform_3, window_bounds = array<i64: 1, 8, 8, 16>}]} {
    %c8_i32 = arith.constant 8 : i32
    %0 = arith.muli %arg1, %c8_i32 : i32
    %cst = arith.constant 0.000000e+00 : f32
    %1 = vector.broadcast %cst : f32 to vector<64x16xf32>
    %c0_i32 = arith.constant 0 : i32
    %2 = arith.addi %0, %c0_i32 : i32
    %c0 = arith.constant 0 : index
    %3 = arith.index_cast %2 : i32 to index
    %c0_0 = arith.constant 0 : index
    %c0_1 = arith.constant 0 : index
    %4 = vector.load %arg2[%c0, %3, %c0_0, %c0_1] : memref<1x10x10x8xbf16, #tpu.memory_space<vmem>>, vector<1x8x8x8xbf16>
    %5 = vector.shape_cast %4 : vector<1x8x8x8xbf16> to vector<8x8x8xbf16>
    %6 = vector.shape_cast %5 : vector<8x8x8xbf16> to vector<64x8xbf16>
    %c0_2 = arith.constant 0 : index
    %c0_3 = arith.constant 0 : index
    %c0_4 = arith.constant 0 : index
    %7 = vector.load %arg3[%c0_2, %c0_3, %c0_4] : memref<9x8x16xbf16, #tpu.memory_space<vmem>>, vector<1x8x16xbf16>
    %8 = vector.shape_cast %7 : vector<1x8x16xbf16> to vector<8x16xbf16>
    %cst_5 = arith.constant dense<0.000000e+00> : vector<64x16xf32>
    %9 = tpu.matmul %6, %8, %cst_5 {dimension_numbers = #tpu.dot_dimension_numbers<[1], [0], [0], [1], [0, 0, 1, 1], [], []>} : vector<64x8xbf16>, vector<8x16xbf16>, vector<64x16xf32> -> vector<64x16xf32>
    %10 = arith.addf %1, %9 : vector<64x16xf32>
    %c0_i32_6 = arith.constant 0 : i32
    %11 = arith.addi %0, %c0_i32_6 : i32
    %c0_7 = arith.constant 0 : index
    %12 = arith.index_cast %11 : i32 to index
    %c1 = arith.constant 1 : index
    %c0_8 = arith.constant 0 : index
    %13 = vector.load %arg2[%c0_7, %12, %c1, %c0_8] : memref<1x10x10x8xbf16, #tpu.memory_space<vmem>>, vector<1x8x8x8xbf16>
    %14 = vector.shape_cast %13 : vector<1x8x8x8xbf16> to vector<8x8x8xbf16>
    %15 = vector.shape_cast %14 : vector<8x8x8xbf16> to vector<64x8xbf16>
    %c1_9 = arith.constant 1 : index
    %c0_10 = arith.constant 0 : index
    %c0_11 = arith.constant 0 : index
    %16 = vector.load %arg3[%c1_9, %c0_10, %c0_11] : memref<9x8x16xbf16, #tpu.memory_space<vmem>>, vector<1x8x16xbf16>
    %17 = vector.shape_cast %16 : vector<1x8x16xbf16> to vector<8x16xbf16>
    %cst_12 = arith.constant dense<0.000000e+00> : vector<64x16xf32>
    %18 = tpu.matmul %15, %17, %cst_12 {dimension_numbers = #tpu.dot_dimension_numbers<[1], [0], [0], [1], [0, 0, 1, 1], [], []>} : vector<64x8xbf16>, vector<8x16xbf16>, vector<64x16xf32> -> vector<64x16xf32>
    %19 = arith.addf %10, %18 : vector<64x16xf32>
    %c0_i32_13 = arith.constant 0 : i32
    %20 = arith.addi %0, %c0_i32_13 : i32
    %c0_14 = arith.constant 0 : index
    %21 = arith.index_cast %20 : i32 to index
    %c2 = arith.constant 2 : index
    %c0_15 = arith.constant 0 : index
    %22 = vector.load %arg2[%c0_14, %21, %c2, %c0_15] : memref<1x10x10x8xbf16, #tpu.memory_space<vmem>>, vector<1x8x8x8xbf16>
    %23 = vector.shape_cast %22 : vector<1x8x8x8xbf16> to vector<8x8x8xbf16>
    %24 = vector.shape_cast %23 : vector<8x8x8xbf16> to vector<64x8xbf16>
    %c2_16 = arith.constant 2 : index
    %c0_17 = arith.constant 0 : index
    %c0_18 = arith.constant 0 : index
    %25 = vector.load %arg3[%c2_16, %c0_17, %c0_18] : memref<9x8x16xbf16, #tpu.memory_space<vmem>>, vector<1x8x16xbf16>
    %26 = vector.shape_cast %25 : vector<1x8x16xbf16> to vector<8x16xbf16>
    %cst_19 = arith.constant dense<0.000000e+00> : vector<64x16xf32>
    %27 = tpu.matmul %24, %26, %cst_19 {dimension_numbers = #tpu.dot_dimension_numbers<[1], [0], [0], [1], [0, 0, 1, 1], [], []>} : vector<64x8xbf16>, vector<8x16xbf16>, vector<64x16xf32> -> vector<64x16xf32>
    %28 = arith.addf %19, %27 : vector<64x16xf32>
    %c1_i32 = arith.constant 1 : i32
    %29 = arith.addi %0, %c1_i32 : i32
    %c0_20 = arith.constant 0 : index
    %30 = arith.index_cast %29 : i32 to index
    %c0_21 = arith.constant 0 : index
    %c0_22 = arith.constant 0 : index
    %31 = vector.load %arg2[%c0_20, %30, %c0_21, %c0_22] : memref<1x10x10x8xbf16, #tpu.memory_space<vmem>>, vector<1x8x8x8xbf16>
    %32 = vector.shape_cast %31 : vector<1x8x8x8xbf16> to vector<8x8x8xbf16>
    %33 = vector.shape_cast %32 : vector<8x8x8xbf16> to vector<64x8xbf16>
    %c3 = arith.constant 3 : index
    %c0_23 = arith.constant 0 : index
    %c0_24 = arith.constant 0 : index
    %34 = vector.load %arg3[%c3, %c0_23, %c0_24] : memref<9x8x16xbf16, #tpu.memory_space<vmem>>, vector<1x8x16xbf16>
    %35 = vector.shape_cast %34 : vector<1x8x16xbf16> to vector<8x16xbf16>
    %cst_25 = arith.constant dense<0.000000e+00> : vector<64x16xf32>
    %36 = tpu.matmul %33, %35, %cst_25 {dimension_numbers = #tpu.dot_dimension_numbers<[1], [0], [0], [1], [0, 0, 1, 1], [], []>} : vector<64x8xbf16>, vector<8x16xbf16>, vector<64x16xf32> -> vector<64x16xf32>
    %37 = arith.addf %28, %36 : vector<64x16xf32>
    %c1_i32_26 = arith.constant 1 : i32
    %38 = arith.addi %0, %c1_i32_26 : i32
    %c0_27 = arith.constant 0 : index
    %39 = arith.index_cast %38 : i32 to index
    %c1_28 = arith.constant 1 : index
    %c0_29 = arith.constant 0 : index
    %40 = vector.load %arg2[%c0_27, %39, %c1_28, %c0_29] : memref<1x10x10x8xbf16, #tpu.memory_space<vmem>>, vector<1x8x8x8xbf16>
    %41 = vector.shape_cast %40 : vector<1x8x8x8xbf16> to vector<8x8x8xbf16>
    %42 = vector.shape_cast %41 : vector<8x8x8xbf16> to vector<64x8xbf16>
    %c4 = arith.constant 4 : index
    %c0_30 = arith.constant 0 : index
    %c0_31 = arith.constant 0 : index
    %43 = vector.load %arg3[%c4, %c0_30, %c0_31] : memref<9x8x16xbf16, #tpu.memory_space<vmem>>, vector<1x8x16xbf16>
    %44 = vector.shape_cast %43 : vector<1x8x16xbf16> to vector<8x16xbf16>
    %cst_32 = arith.constant dense<0.000000e+00> : vector<64x16xf32>
    %45 = tpu.matmul %42, %44, %cst_32 {dimension_numbers = #tpu.dot_dimension_numbers<[1], [0], [0], [1], [0, 0, 1, 1], [], []>} : vector<64x8xbf16>, vector<8x16xbf16>, vector<64x16xf32> -> vector<64x16xf32>
    %46 = arith.addf %37, %45 : vector<64x16xf32>
    %c1_i32_33 = arith.constant 1 : i32
    %47 = arith.addi %0, %c1_i32_33 : i32
    %c0_34 = arith.constant 0 : index
    %48 = arith.index_cast %47 : i32 to index
    %c2_35 = arith.constant 2 : index
    %c0_36 = arith.constant 0 : index
    %49 = vector.load %arg2[%c0_34, %48, %c2_35, %c0_36] : memref<1x10x10x8xbf16, #tpu.memory_space<vmem>>, vector<1x8x8x8xbf16>
    %50 = vector.shape_cast %49 : vector<1x8x8x8xbf16> to vector<8x8x8xbf16>
    %51 = vector.shape_cast %50 : vector<8x8x8xbf16> to vector<64x8xbf16>
    %c5 = arith.constant 5 : index
    %c0_37 = arith.constant 0 : index
    %c0_38 = arith.constant 0 : index
    %52 = vector.load %arg3[%c5, %c0_37, %c0_38] : memref<9x8x16xbf16, #tpu.memory_space<vmem>>, vector<1x8x16xbf16>
    %53 = vector.shape_cast %52 : vector<1x8x16xbf16> to vector<8x16xbf16>
    %cst_39 = arith.constant dense<0.000000e+00> : vector<64x16xf32>
    %54 = tpu.matmul %51, %53, %cst_39 {dimension_numbers = #tpu.dot_dimension_numbers<[1], [0], [0], [1], [0, 0, 1, 1], [], []>} : vector<64x8xbf16>, vector<8x16xbf16>, vector<64x16xf32> -> vector<64x16xf32>
    %55 = arith.addf %46, %54 : vector<64x16xf32>
    %c2_i32 = arith.constant 2 : i32
    %56 = arith.addi %0, %c2_i32 : i32
    %c0_40 = arith.constant 0 : index
    %57 = arith.index_cast %56 : i32 to index
    %c0_41 = arith.constant 0 : index
    %c0_42 = arith.constant 0 : index
    %58 = vector.load %arg2[%c0_40, %57, %c0_41, %c0_42] : memref<1x10x10x8xbf16, #tpu.memory_space<vmem>>, vector<1x8x8x8xbf16>
    %59 = vector.shape_cast %58 : vector<1x8x8x8xbf16> to vector<8x8x8xbf16>
    %60 = vector.shape_cast %59 : vector<8x8x8xbf16> to vector<64x8xbf16>
    %c6 = arith.constant 6 : index
    %c0_43 = arith.constant 0 : index
    %c0_44 = arith.constant 0 : index
    %61 = vector.load %arg3[%c6, %c0_43, %c0_44] : memref<9x8x16xbf16, #tpu.memory_space<vmem>>, vector<1x8x16xbf16>
    %62 = vector.shape_cast %61 : vector<1x8x16xbf16> to vector<8x16xbf16>
    %cst_45 = arith.constant dense<0.000000e+00> : vector<64x16xf32>
    %63 = tpu.matmul %60, %62, %cst_45 {dimension_numbers = #tpu.dot_dimension_numbers<[1], [0], [0], [1], [0, 0, 1, 1], [], []>} : vector<64x8xbf16>, vector<8x16xbf16>, vector<64x16xf32> -> vector<64x16xf32>
    %64 = arith.addf %55, %63 : vector<64x16xf32>
    %c2_i32_46 = arith.constant 2 : i32
    %65 = arith.addi %0, %c2_i32_46 : i32
    %c0_47 = arith.constant 0 : index
    %66 = arith.index_cast %65 : i32 to index
    %c1_48 = arith.constant 1 : index
    %c0_49 = arith.constant 0 : index
    %67 = vector.load %arg2[%c0_47, %66, %c1_48, %c0_49] : memref<1x10x10x8xbf16, #tpu.memory_space<vmem>>, vector<1x8x8x8xbf16>
    %68 = vector.shape_cast %67 : vector<1x8x8x8xbf16> to vector<8x8x8xbf16>
    %69 = vector.shape_cast %68 : vector<8x8x8xbf16> to vector<64x8xbf16>
    %c7 = arith.constant 7 : index
    %c0_50 = arith.constant 0 : index
    %c0_51 = arith.constant 0 : index
    %70 = vector.load %arg3[%c7, %c0_50, %c0_51] : memref<9x8x16xbf16, #tpu.memory_space<vmem>>, vector<1x8x16xbf16>
    %71 = vector.shape_cast %70 : vector<1x8x16xbf16> to vector<8x16xbf16>
    %cst_52 = arith.constant dense<0.000000e+00> : vector<64x16xf32>
    %72 = tpu.matmul %69, %71, %cst_52 {dimension_numbers = #tpu.dot_dimension_numbers<[1], [0], [0], [1], [0, 0, 1, 1], [], []>} : vector<64x8xbf16>, vector<8x16xbf16>, vector<64x16xf32> -> vector<64x16xf32>
    %73 = arith.addf %64, %72 : vector<64x16xf32>
    %c2_i32_53 = arith.constant 2 : i32
    %74 = arith.addi %0, %c2_i32_53 : i32
    %c0_54 = arith.constant 0 : index
    %75 = arith.index_cast %74 : i32 to index
    %c2_55 = arith.constant 2 : index
    %c0_56 = arith.constant 0 : index
    %76 = vector.load %arg2[%c0_54, %75, %c2_55, %c0_56] : memref<1x10x10x8xbf16, #tpu.memory_space<vmem>>, vector<1x8x8x8xbf16>
    %77 = vector.shape_cast %76 : vector<1x8x8x8xbf16> to vector<8x8x8xbf16>
    %78 = vector.shape_cast %77 : vector<8x8x8xbf16> to vector<64x8xbf16>
    %c8 = arith.constant 8 : index
    %c0_57 = arith.constant 0 : index
    %c0_58 = arith.constant 0 : index
    %79 = vector.load %arg3[%c8, %c0_57, %c0_58] : memref<9x8x16xbf16, #tpu.memory_space<vmem>>, vector<1x8x16xbf16>
    %80 = vector.shape_cast %79 : vector<1x8x16xbf16> to vector<8x16xbf16>
    %cst_59 = arith.constant dense<0.000000e+00> : vector<64x16xf32>
    %81 = tpu.matmul %78, %80, %cst_59 {dimension_numbers = #tpu.dot_dimension_numbers<[1], [0], [0], [1], [0, 0, 1, 1], [], []>} : vector<64x8xbf16>, vector<8x16xbf16>, vector<64x16xf32> -> vector<64x16xf32>
    %82 = arith.addf %73, %81 : vector<64x16xf32>
    %c0_60 = arith.constant 0 : index
    %c0_61 = arith.constant 0 : index
    %83 = vector.load %arg4[%c0_60, %c0_61] : memref<1x16xf32, #tpu.memory_space<vmem>>, vector<1x16xf32>
    %84 = vector.broadcast %83 : vector<1x16xf32> to vector<64x16xf32>
    %85 = arith.addf %82, %84 : vector<64x16xf32>
    %cst_62 = arith.constant 0.000000e+00 : f32
    %86 = vector.broadcast %cst_62 : f32 to vector<64x16xf32>
    %87 = arith.maximumf %85, %86 : vector<64x16xf32>
    %88 = vector.shape_cast %87 : vector<64x16xf32> to vector<1x8x8x16xf32>
    %c0_63 = arith.constant 0 : index
    %c0_64 = arith.constant 0 : index
    %c0_65 = arith.constant 0 : index
    %c0_66 = arith.constant 0 : index
    %89 = vector.load %arg5[%c0_63, %c0_64, %c0_65, %c0_66] : memref<1x8x8x16xf32, #tpu.memory_space<vmem>>, vector<1x8x8x16xf32>
    tpu.vector_store %arg5[%c0_63, %c0_64, %c0_65, %c0_66], %88 {strides = array<i32>} : memref<1x8x8x16xf32, #tpu.memory_space<vmem>>, vector<1x8x8x16xf32>,
    return
  }
  func.func @transform_0(%arg0: i32, %arg1: i32) -> (i32, i32, i32, i32) {
    %c0_i32 = arith.constant 0 : i32
    %c0_i32_0 = arith.constant 0 : i32
    %c0_i32_1 = arith.constant 0 : i32
    %c0_i32_2 = arith.constant 0 : i32
    return %arg0, %c0_i32, %c0_i32_0, %c0_i32_1 : i32, i32, i32, i32
  }
  func.func @transform_1(%arg0: i32, %arg1: i32) -> (i32, i32, i32) {
    %c0_i32 = arith.constant 0 : i32
    %c0_i32_0 = arith.constant 0 : i32
    %c0_i32_1 = arith.constant 0 : i32
    %c0_i32_2 = arith.constant 0 : i32
    return %c0_i32, %c0_i32_0, %c0_i32_1 : i32, i32, i32
  }
  func.func @transform_2(%arg0: i32, %arg1: i32) -> (i32, i32) {
    %c0_i32 = arith.constant 0 : i32
    %c0_i32_0 = arith.constant 0 : i32
    %c0_i32_1 = arith.constant 0 : i32
    return %c0_i32, %c0_i32_0 : i32, i32
  }
  func.func @transform_3(%arg0: i32, %arg1: i32) -> (i32, i32, i32, i32) {
    %c0_i32 = arith.constant 0 : i32
    %c0_i32_0 = arith.constant 0 : i32
    %c0_i32_1 = arith.constant 0 : i32
    return %arg0, %arg1, %c0_i32, %c0_i32_0 : i32, i32, i32, i32
  }
}

</mosaic_0001>

<bundles_post_ra>
// kernel: conv_seq_forward.2
= control target key start
LH: loop header
LB: loop body
LE: loop exit
PB: predicated region body
PF: predicated region fallthrough
CT: control target
= control target key end

     0   :  { %s2219_s12 = smov 0   ;;  %s2221_s13 = smov 0   ;;  %s2515_s0 = inlined_call_operand.vmem [shape: bf16[8,9,9,4], index: 0, kind: input, shape index: {}]   ;;  %s2516_s1 = inlined_call_operand.vmem [shape: bf16[9,4,8], index: 1, kind: input, shape index: {}]   ;;  %s2517_s2 = inlined_call_operand.vmem [shape: f32[1,8], index: 2, kind: input, shape index: {}]   ;;  %s2518_s3 = inlined_call_operand.vmem [shape: bf16[2,8,8,8], index: 3, kind: output, shape index: {}]  }
   0x1   :  { %s2223_s14 = smov 0  }
   0x2 LB: > { %s25_s15 = sadd.s32 1, %s2193_s13  ;;  %p1754_p0 = scmp.ge.s32.totalorder %s2197_s14, 1  ;;  %s2197_s14 = sphi %s2223_s14, %s13_s14   ;;  %s2193_s13 = sphi %s2221_s13, %s2522_s13   ;;  %s2189_s12 = sphi %s2219_s12, %s2521_s12  }
   0x3   : > { %p27_p1 = scmp.ge.s32.totalorder %s25_s15, 2  ;;  %p153_p2 = scmp.lt.s32.totalorder %s2197_s14, 3 }
   0x5   : > { %s2524_s15 = smov (%p27_p1, %s25_s15), 0  ;;  %p154_p3 = pnand %p1754_p0, %p153_p2 }
   0x6   : > { %v1767_v0 = vld [vmem:[%s2516_s1 + $0x2] sm:$0x3] (!%p154_p3)  ;;  %vm259_vm0 = vcmask (!%p154_p3), 1041408   ;;  %v2245_v1 = vld [vmem:[%s2516_s1 + $0x8] sm:$0x3] (!%p154_p3)  ;;  %s1755_s20 = sshll.u32 (!%p154_p3), %s2189_s12, 2 }
   0x7   : > { %157 = sbr.rel (%p154_p3) target bundleno = 319 (0x13f), region = 32  ;;  %2116 = vmatprep.subr.msk.bf16.mxu1 (!%p154_p3), %vm259_vm0, %v1767_v0  ;;  %2120 = vmatprep.subr.msk.bf16.mxu0 (!%p154_p3), %vm259_vm0, %v2245_v1  ;;  %v261_v2 = vsel (!%p154_p3), %vm259_vm0, %v1767_v0, 0  ;;  %v2254_v3 = vsel (!%p154_p3), %vm259_vm0, %v2245_v1, 0  ;;  %p183_p4 = scmp.lt.s32.totalorder (!%p154_p3), %s1755_s20, 7  ;;  %v212_v4 = vld [vmem:[%s2516_s1] sm:$0x3] (!%p154_p3) }
   0x8   : > { %1961 = vmatpush3.bf16.msra.mxu1 (!%p154_p3), %v261_v2  ;;  %2001 = vmatpush3.bf16.msra.mxu0 (!%p154_p3), %v2254_v3  ;;  %v1843_v5 = vld [vmem:[%s2516_s1 + $0xa] sm:$0x3] (!%p154_p3)  ;;  %vm246_vm1 = vcmask (!%p154_p3), 31744   ;;  %v361_v6 = vsel (!%p154_p3), %vm259_vm0, %v212_v4, 0  ;;  %v1860_v9 = vld [vmem:[%s2516_s1 + $0xc] sm:$0x3] (!%p154_p3) }
   0x9   : > { %2117 = vmatprep.subr.msk.bf16.mxu1 (!%p154_p3), %vm259_vm0, %v212_v4  ;;  %2122 = vmatprep.subr.msk.bf16.mxu0 (!%p154_p3), %vm259_vm0, %v1843_v5  ;;  %v1058_v7 = vsel (!%p154_p3), %vm259_vm0, %v1843_v5, 0  ;;  %v1784_v10 = vld [vmem:[%s2516_s1 + $0x4] sm:$0x3] (!%p154_p3)  ;;  %vm444_vm2 = vsmask.f32 (!%p154_p3), 3328  ;;  %v2288_v15 = vsel (!%p154_p3), %vm259_vm0, %v1860_v9, 0 }
   0xa   : > { %vm445_vm3 = vsmask.f32 (!%p154_p3), 7440  ;;  %v2291_v16 = vsel (!%p154_p3), %vm259_vm0, %v1784_v10, 0  ;;  %p190_p5 = scmp.lt.s32.totalorder (!%p154_p3), %s2189_s12, 1  ;;  %vm1637_vm5 = vcmask (!%p154_p3), 60416  }
   0xb   : > { %vm2308_vm4 = vmor (!%p154_p3), %vm444_vm2, %vm445_vm3 }
   0xe   : > { %s2526_s20 = smov (!%p183_p4, %s1755_s20), 7  ;;  %s2528_s12 = smov (!%p190_p5, %s2189_s12), 1 }
   0xf   : > { %s2126_s25 = smul.u32 72, %s2526_s20  ;;  %s1914_s18 = sshll.u32 %s2528_s12, 5 }
  0x10   : > { %s2488_s21 = scalar_lea.vmem %s2518_s3, %s1914_s18 }
  0x11   : > { %s2268_s28 = scalar_lea.vmem %s2515_s0, %s2126_s25 }
  0x12   : > { %v2151_v8 = vld [vmem:[%s2268_s28 + $0x48] ss:$8 sps:$4 sm:$0xff]   ;;  %v2152_v11 = vld [vmem:[%s2268_s28 + $0xd8] ss:$8 sps:$4 sm:$0xff]   ;;  %v1828_v19 = vld [vmem:[%s2268_s28 + $0x94] sm:$0x1] }
  0x13   : > { %1962 = vmatprep.mubr.msk.bf16.mxu1 %vm246_vm1, %v2151_v8  ;;  %v2153_v12 = vld [vmem:[%s2268_s28 + $0x58] ss:$8 sps:$4 sm:$0xff]   ;;  %2002 = vmatprep.mubr.msk.bf16.mxu0 %vm246_vm1, %v2152_v11  ;;  %v2154_v13 = vld [vmem:[%s2268_s28 + $0xe8] ss:$8 sps:$4 sm:$0xff]   ;;  %v1830_v21 = vld [vmem:[%s2268_s28 + $0x9c] sm:$0x1] }
  0x14   : > { %1963 = vmatmul.mubr.msk.bf16.vlgmr.msra.gmra.mrb[0].mxu1 %vm246_vm1, %v2153_v12  ;;  %v2155_v14 = vld [vmem:[%s2268_s28 + $0x68] ss:$8 sps:$4 sm:$0xff]   ;;  %2003 = vmatmul.mubr.msk.bf16.vlgmr.msra.gmra.mrb[0].mxu0 %vm246_vm1, %v2154_v13  ;;  %v2156_v17 = vld [vmem:[%s2268_s28 + $0x78] ss:$8 sps:$4 sm:$0xff]   ;;  %v929_v24 = vshll.u32 %v1828_v19, 16  ;;  %v943_v27 = vshll.u32 %v1830_v21, 16 }
  0x15   : > { %1971 = vmatpush3.bf16.msra.mxu1 %v361_v6  ;;  %2011 = vmatpush3.bf16.msra.mxu0 %v1058_v7  ;;  %v1827_v18 = vld [vmem:[%s2268_s28 + $0x90] sm:$0xf]  ;;  %v1829_v20 = vld [vmem:[%s2268_s28 + $0x98] sm:$0xf]  ;;  %v1831_v28 = vld [vmem:[%s2268_s28 + $0xa0] sm:$0xf] }
  0x16   : > { %1966 = vmatprep.mubr.msk.bf16.mxu1 %vm246_vm1, %v2155_v14  ;;  %v920_v22 = vshrl.u32 %v1827_v18, 16  ;;  %v923_v23 = vshll.u32 %v1827_v18, 16  ;;  %v934_v25 = vshrl.u32 %v1829_v20, 16  ;;  %2123 = vmatprep.subr.msk.bf16.mxu0 %vm259_vm0, %v1860_v9  ;;  %v937_v26 = vshll.u32 %v1829_v20, 16  ;;  %v1832_v29 = vld [vmem:[%s2268_s28 + $0xa4] sm:$0x1] }
  0x17   : > { %2118 = vmatprep.subr.msk.bf16.mxu1 %vm259_vm0, %v1784_v10  ;;  %v931_v32 = vrot.slane %v929_v24, 5  ;;  %v1833_v34 = vld [vmem:[%s2268_s28 + $0xa8] sm:$0xf]  ;;  %v945_v36 = vrot.slane %v943_v27, 5  ;;  %v1834_v37 = vld [vmem:[%s2268_s28 + $0xac] sm:$0x1] }
  0x18   : > { %v922_v30 = vrot.slane %v920_v22, 4  ;;  %v925_v31 = vrot.slane %v923_v23, 5  ;;  %v936_v33 = vrot.slane %v934_v25, 4  ;;  %v939_v35 = vrot.slane %v937_v26, 5  ;;  %v2157_v53 = vld [vmem:[%s2268_s28] ss:$8 sps:$4 sm:$0xff]  }
  0x19   : > { %v948_v38 = vshrl.u32 %v1831_v28, 16  ;;  %v951_v39 = vshll.u32 %v1831_v28, 16  ;;  %v957_v41 = vshll.u32 %v1832_v29, 16  ;;  %v962_v42 = vshrl.u32 %v1833_v34, 16  ;;  %v2158_v59 = vld [vmem:[%s2268_s28 + $0x10] ss:$8 sps:$4 sm:$0xff]  }
  0x1a   : > { %v926_v40 = vor.u32 %v925_v31, %v922_v30  ;;  %v965_v43 = vshll.u32 %v1833_v34, 16  ;;  %v940_v45 = vor.u32 %v939_v35, %v936_v33  ;;  %v971_v48 = vshll.u32 %v1834_v37, 16  ;;  %v1835_v60 = vld [vmem:[%s2268_s28 + $0xb0] sm:$0xf]  ;;  %v1836_v61 = vld [vmem:[%s2268_s28 + $0xb4] sm:$0x1] }
  0x1b   : > { %v950_v46 = vrot.slane %v948_v38, 4  ;;  %v953_v47 = vrot.slane %v951_v39, 5  ;;  %v959_v50 = vrot.slane %v957_v41, 5  ;;  %v964_v51 = vrot.slane %v962_v42, 4  ;;  %v1837_v0 = vld [vmem:[%s2268_s28 + $0xb8] sm:$0xf] }
  0x1c   : > { %1967 = vmatmul.mubr.msk.bf16.gmra.mrb[4].mxu1 %vm246_vm1, %v2156_v17  ;;  %v927_v49 = vrot.slane %v926_v40, 4  ;;  %v967_v52 = vrot.slane %v965_v43, 5  ;;  %v941_v54 = vrot.slane %v940_v45, 4  ;;  %v973_v56 = vrot.slane %v971_v48, 5  ;;  %v1838_v2 = vld [vmem:[%s2268_s28 + $0xbc] sm:$0x1] }
  0x1d   : > { %v954_v55 = vor.u32 %v953_v47, %v950_v46  ;;  %1972 = vmatprep.mubr.msk.bf16.mxu1 %vm246_vm1, %v2157_v53  ;;  %v976_v4 = vshrl.u32 %v1835_v60, 16  ;;  %v979_v7 = vshll.u32 %v1835_v60, 16  ;;  %v985_v8 = vshll.u32 %v1836_v61, 16  ;;  %v1839_v9 = vld [vmem:[%s2268_s28 + $0xc0] sm:$0xf] }
  0x1e   : > { %v932_v57 = vsel %vm2308_vm4, %v927_v49, %v931_v32  ;;  %v968_v58 = vor.u32 %v967_v52, %v964_v51  ;;  %v946_v62 = vsel %vm2308_vm4, %v941_v54, %v945_v36  ;;  %v2327_v10 = vld [vmem:[%s2516_s1 + $0x6] sm:$0x3]  ;;  %v990_v13 = vshrl.u32 %v1837_v0, 16  ;;  %v1840_v17 = vld [vmem:[%s2268_s28 + $0xc4] sm:$0x1] }
  0x1f   : > { %v955_v63 = vrot.slane %v954_v55, 4  ;;  %v1844_v5 = vcombine.low %v932_v57, %v946_v62  ;;  %v978_v12 = vrot.slane %v976_v4, 4  ;;  %v993_v14 = vshll.u32 %v1837_v0, 16  ;;  %v1841_v22 = vld [vmem:[%s2268_s28 + $0xc8] sm:$0xf] }
  0x20   : > { %v969_v6 = vrot.slane %v968_v58, 4  ;;  %v981_v19 = vrot.slane %v979_v7, 5  ;;  %v987_v20 = vrot.slane %v985_v8, 5  ;;  %v999_v21 = vshll.u32 %v1838_v2, 16  ;;  %v2339_v23 = vld [vmem:[%s2516_s1 + $0xe] sm:$0x3] }
  0x21   : > { %v960_v11 = vsel %vm2308_vm4, %v955_v63, %v959_v50  ;;  %2012 = vmatprep.mubr.msk.bf16.mxu0 %vm246_vm1, %v1844_v5  ;;  %v992_v25 = vrot.slane %v990_v13, 4  ;;  %v995_v26 = vrot.slane %v993_v14, 5  ;;  %v1842_v27 = vld [vmem:[%s2268_s28 + $0xcc] sm:$0x1]  ;;  %v1004_v28 = vshrl.u32 %v1839_v9, 16 }
  0x22   : > { %v974_v18 = vsel %vm2308_vm4, %v969_v6, %v973_v56  ;;  %v982_v29 = vor.u32 %v981_v19, %v978_v12  ;;  %v1001_v30 = vrot.slane %v999_v21, 5  ;;  %v1007_v31 = vshll.u32 %v1839_v9, 16  ;;  %v2161_v53 = vld [vmem:[%s2268_s28 + $0x8] ss:$8 sps:$4 sm:$0xff]   ;;  %v428_v54 = vld [vmem:[%s2268_s28] sm:$0xf] }
  0x23   : > { %v1845_v24 = vcombine.low %v960_v11, %v974_v18  ;;  %v1013_v32 = vshll.u32 %v1840_v17, 16  ;;  %v996_v33 = vor.u32 %v995_v26, %v992_v25  ;;  %v1006_v34 = vrot.slane %v1004_v28, 4  ;;  %v429_v56 = vld [vmem:[%s2268_s28 + $0x4] sm:$0x1]  ;;  %v430_v57 = vld [vmem:[%s2268_s28 + $0x8] sm:$0xf] }
  0x24   : > { %1973 = vmatmul.mubr.msk.bf16.vlgmr.msra.gmra.mrb[0].mxu1 %vm246_vm1, %v2158_v59  ;;  %v1018_v35 = vshrl.u32 %v1841_v22, 16  ;;  %v1021_v36 = vshll.u32 %v1841_v22, 16  ;;  %v983_v37 = vrot.slane %v982_v29, 4  ;;  %v1009_v38 = vrot.slane %v1007_v31, 5  ;;  %v431_v58 = vld [vmem:[%s2268_s28 + $0xc] sm:$0x1] }
  0x25   : > { %1981 = vmatpush3.bf16.msra.mxu1 %v2291_v16  ;;  %2013 = vmatmul.mubr.msk.bf16.vlgmr.msra.gmra.mrb[0].mxu0 %vm246_vm1, %v1845_v24  ;;  %v1027_v39 = vshll.u32 %v1842_v27, 16  ;;  %v2159_v16 = vld [vmem:[%s2268_s28 + $0x20] ss:$8 sps:$4 sm:$0xff]   ;;  %v997_v40 = vrot.slane %v996_v33, 4  ;;  %v1015_v46 = vrot.slane %v1013_v32, 5  ;;  %v448_v60 = vshrl.u32 %v428_v54, 16 }
  0x26   : > { %2119 = vmatprep.subr.msk.bf16.mxu1 %vm259_vm0, %v2327_v10  ;;  %2021 = vmatpush3.bf16.msra.mxu0 %v2288_v15  ;;  %v1020_v41 = vrot.slane %v1018_v35, 4  ;;  %v1023_v42 = vrot.slane %v1021_v36, 5  ;;  %v988_v43 = vsel %vm2308_vm4, %v983_v37, %v987_v20  ;;  %v1010_v45 = vor.u32 %v1009_v38, %v1006_v34  ;;  %v2160_v15 = vld [vmem:[%s2268_s28 + $0x30] ss:$8 sps:$4 sm:$0xff]   ;;  %v433_v6 = vld [vmem:[%s2268_s28 + $0x14] sm:$0x1] }
  0x27   : > { %2124 = vmatprep.subr.msk.bf16.mxu0 %vm259_vm0, %v2339_v23  ;;  %1976 = vmatprep.mubr.msk.bf16.mxu1 %vm246_vm1, %v2159_v16  ;;  %v1002_v47 = vsel %vm2308_vm4, %v997_v40, %v1001_v30  ;;  %v1029_v49 = vrot.slane %v1027_v39, 5  ;;  %v451_v61 = vshll.u32 %v428_v54, 16  ;;  %v457_v62 = vshll.u32 %v429_v56, 16  ;;  %v432_v63 = vld [vmem:[%s2268_s28 + $0x10] sm:$0xf] }
  0x28   : > { %v1024_v48 = vor.u32 %v1023_v42, %v1020_v41  ;;  %v1846_v50 = vcombine.low %v988_v43, %v1002_v47  ;;  %v1011_v51 = vrot.slane %v1010_v45, 4  ;;  %v462_v2 = vshrl.u32 %v430_v57, 16  ;;  %v434_v11 = vld [vmem:[%s2268_s28 + $0x18] sm:$0xf]  ;;  %v435_v18 = vld [vmem:[%s2268_s28 + $0x1c] sm:$0x1] }
  0x29   : > { %v465_v4 = vshll.u32 %v430_v57, 16  ;;  %v471_v5 = vshll.u32 %v431_v58, 16  ;;  %v450_v7 = vrot.slane %v448_v60, 4  ;;  %v453_v8 = vrot.slane %v451_v61, 5  ;;  %v2162_v29 = vld [vmem:[%s2268_s28 + $0x18] ss:$8 sps:$4 sm:$0xff]  }
  0x2a   : > { %v1025_v52 = vrot.slane %v1024_v48, 4  ;;  %2016 = vmatprep.mubr.msk.bf16.mxu0 %vm246_vm1, %v1846_v50  ;;  %v1016_v55 = vsel %vm2308_vm4, %v1011_v51, %v1015_v46  ;;  %v459_v9 = vrot.slane %v457_v62, 5  ;;  %v476_v12 = vshrl.u32 %v432_v63, 16  ;;  %v2163_v37 = vld [vmem:[%s2268_s28 + $0x28] ss:$8 sps:$4 sm:$0xff]  }
  0x2b   : > { %v464_v13 = vrot.slane %v462_v2, 4  ;;  %v467_v14 = vrot.slane %v465_v4, 5  ;;  %v473_v17 = vrot.slane %v471_v5, 5  ;;  %v479_v19 = vshll.u32 %v432_v63, 16  ;;  %v436_v40 = vld [vmem:[%s2268_s28 + $0x20] sm:$0xf] }
  0x2c   : > { %1977 = vmatmul.mubr.msk.bf16.gmra.mrb[4].mxu1 %vm246_vm1, %v2160_v15  ;;  %v1030_v59 = vsel %vm2308_vm4, %v1025_v52, %v1029_v49  ;;  %v454_v20 = vor.u32 %v453_v8, %v450_v7  ;;  %v478_v21 = vrot.slane %v476_v12, 4  ;;  %v485_v22 = vshll.u32 %v433_v6, 16  ;;  %v437_v45 = vld [vmem:[%s2268_s28 + $0x24] sm:$0x1]  ;;  %v438_v46 = vld [vmem:[%s2268_s28 + $0x28] sm:$0xf] }
  0x2d   : > { %v1847_v0 = vcombine.low %v1016_v55, %v1030_v59  ;;  %v490_v24 = vshrl.u32 %v434_v11, 16  ;;  %v468_v25 = vor.u32 %v467_v14, %v464_v13  ;;  %v481_v26 = vrot.slane %v479_v19, 5  ;;  %v439_v48 = vld [vmem:[%s2268_s28 + $0x2c] sm:$0x1]  ;;  %v440_v55 = vld [vmem:[%s2268_s28 + $0x30] sm:$0xf] }
  0x2e   : > { %v493_v27 = vshll.u32 %v434_v11, 16  ;;  %v499_v28 = vshll.u32 %v435_v18, 16  ;;  %v1301_v30 = vsel %vm259_vm0, %v2339_v23, 0  ;;  %v455_v31 = vrot.slane %v454_v20, 4  ;;  %v2386_v23 = vld [vmem:[%s2516_s1 + $0x10] sm:$0x3] }
  0x2f   : > { %2017 = vmatmul.mubr.msk.bf16.gmra.mrb[4].mxu0 %vm246_vm1, %v1847_v0  ;;  %v487_v32 = vrot.slane %v485_v22, 5  ;;  %v492_v33 = vrot.slane %v490_v24, 4  ;;  %v469_v34 = vrot.slane %v468_v25, 4  ;;  %v482_v35 = vor.u32 %v481_v26, %v478_v21  ;;  %v441_v60 = vld [vmem:[%s2268_s28 + $0x34] sm:$0x1] }
  0x30   : > { %2022 = vmatprep.mubr.msk.bf16.mxu0 %vm246_vm1, %v2161_v53  ;;  %v495_v36 = vrot.slane %v493_v27, 5  ;;  %v460_v38 = vsel %vm2308_vm4, %v455_v31, %v459_v9  ;;  %v501_v39 = vrot.slane %v499_v28, 5  ;;  %v707_v16 = vsel %vm259_vm0, %v2327_v10, 0  ;;  %v2164_v62 = vld [vmem:[%s2268_s28 + $0x38] ss:$8 sps:$4 sm:$0xff]  }
  0x31   : > { %v474_v41 = vsel %vm2308_vm4, %v469_v34, %v473_v17  ;;  %v483_v42 = vrot.slane %v482_v35, 4  ;;  %v504_v15 = vshrl.u32 %v436_v40, 16  ;;  %v507_v49 = vshll.u32 %v436_v40, 16  ;;  %v442_v0 = vld [vmem:[%s2268_s28 + $0x38] sm:$0xf] }
  0x32   : > { %v496_v43 = vor.u32 %v495_v36, %v492_v33  ;;  %v1785_v47 = vcombine.low %v460_v38, %v474_v41  ;;  %v513_v10 = vshll.u32 %v437_v45, 16  ;;  %v518_v50 = vshrl.u32 %v438_v46, 16  ;;  %v443_v2 = vld [vmem:[%s2268_s28 + $0x3c] sm:$0x1]  ;;  %v2165_v14 = vld [vmem:[%s2268_s28 + $0x50] ss:$8 sps:$4 sm:$0xff]  }
  0x33   : > { %v488_v51 = vsel %vm2308_vm4, %v483_v42, %v487_v32  ;;  %v506_v53 = vrot.slane %v504_v15, 4  ;;  %v521_v54 = vshll.u32 %v438_v46, 16  ;;  %v509_v56 = vrot.slane %v507_v49, 5  ;;  %v2166_v35 = vld [vmem:[%s2268_s28 + $0x60] ss:$8 sps:$4 sm:$0xff]  }
  0x34   : > { %v497_v52 = vrot.slane %v496_v43, 4  ;;  %1982 = vmatprep.mubr.msk.bf16.mxu1 %vm246_vm1, %v1785_v47  ;;  %v515_v57 = vrot.slane %v513_v10, 5  ;;  %v520_v58 = vrot.slane %v518_v50, 4  ;;  %v527_v59 = vshll.u32 %v439_v48, 16  ;;  %v1887_v40 = vld [vmem:[%s2268_s28 + $0xc] sm:$0x1] }
  0x35   : > { %v523_v63 = vrot.slane %v521_v54, 5  ;;  %v532_v4 = vshrl.u32 %v440_v55, 16  ;;  %v510_v6 = vor.u32 %v509_v56, %v506_v53  ;;  %v535_v8 = vshll.u32 %v440_v55, 16  ;;  %v1888_v41 = vld [vmem:[%s2268_s28 + $0x10] sm:$0xf] }
  0x36   : > { %v502_v61 = vsel %vm2308_vm4, %v497_v52, %v501_v39  ;;  %v529_v7 = vrot.slane %v527_v59, 5  ;;  %v541_v12 = vshll.u32 %v441_v60, 16  ;;  %v546_v13 = vshrl.u32 %v442_v0, 16  ;;  %v2169_v39 = vld [vmem:[%s2268_s28 + $0x70] ss:$8 sps:$4 sm:$0xff]  }
  0x37   : > { %2023 = vmatmul.mubr.msk.bf16.vlgmr.msra.gmra.mrb[0].mxu0 %vm246_vm1, %v2162_v29  ;;  %v1786_v5 = vcombine.low %v488_v51, %v502_v61  ;;  %v524_v9 = vor.u32 %v523_v63, %v520_v58  ;;  %v534_v11 = vrot.slane %v532_v4, 4  ;;  %v511_v17 = vrot.slane %v510_v6, 4  ;;  %v1889_v42 = vld [vmem:[%s2268_s28 + $0x14] sm:$0x1]  ;;  %v1890_v48 = vld [vmem:[%s2268_s28 + $0x18] sm:$0xf] }
  0x38   : > { %2031 = vmatpush3.bf16.msra.mxu0 %v1301_v30  ;;  %2026 = vmatprep.mubr.msk.bf16.mxu0 %vm246_vm1, %v2163_v37  ;;  %v537_v18 = vrot.slane %v535_v8, 5  ;;  %v549_v19 = vshll.u32 %v442_v0, 16  ;;  %v555_v20 = vshll.u32 %v443_v2, 16  ;;  %v548_v22 = vrot.slane %v546_v13, 4  ;;  %v2167_v37 = vld [vmem:[%s2268_s28 + $0x90] ss:$8 sps:$4 sm:$0xff]  }
  0x39   : > { %2125 = vmatprep.subr.msk.bf16.mxu0 %vm259_vm0, %v2386_v23  ;;  %1983 = vmatmul.mubr.msk.bf16.vlgmr.msra.gmra.mrb[0].mxu1 %vm246_vm1, %v1786_v5  ;;  %v525_v21 = vrot.slane %v524_v9, 4  ;;  %v516_v24 = vsel %vm2308_vm4, %v511_v17, %v515_v57  ;;  %v543_v26 = vrot.slane %v541_v12, 5  ;;  %v1531_v34 = vsel %vm259_vm0, %v2386_v23, 0  ;;  %v1891_v50 = vld [vmem:[%s2268_s28 + $0x1c] sm:$0x1] }
  0x3a   : > { %1991 = vmatpush3.bf16.msra.mxu1 %v707_v16  ;;  %v538_v25 = vor.u32 %v537_v18, %v534_v11  ;;  %v551_v27 = vrot.slane %v549_v19, 5  ;;  %v557_v32 = vrot.slane %v555_v20, 5  ;;  %v1886_v16 = vld [vmem:[%s2268_s28 + $0x8] sm:$0xf]  ;;  %v1402_v23 = vshll.u32 %v1887_v40, 16 }
  0x3b   : > { %2121 = vmatprep.subr.msk.bf16.mxu1 %vm259_vm0, %v2245_v1  ;;  %v530_v28 = vsel %vm2308_vm4, %v525_v21, %v529_v7  ;;  %v1393_v43 = vshrl.u32 %v1886_v16, 16  ;;  %v1396_v45 = vshll.u32 %v1886_v16, 16  ;;  %v1407_v46 = vshrl.u32 %v1888_v41, 16  ;;  %v1892_v51 = vld [vmem:[%s2268_s28 + $0x20] sm:$0xf] }
  0x3c   : > { %v1787_v29 = vcombine.low %v516_v24, %v530_v28  ;;  %v539_v30 = vrot.slane %v538_v25, 4  ;;  %v552_v31 = vor.u32 %v551_v27, %v548_v22  ;;  %v1410_v15 = vshll.u32 %v1888_v41, 16  ;;  %v2168_v52 = vld [vmem:[%s2268_s28 + $0xa0] ss:$8 sps:$4 sm:$0xff]   ;;  %v1893_v58 = vld [vmem:[%s2268_s28 + $0x24] sm:$0x1] }
  0x3d   : > { %v1416_v47 = vshll.u32 %v1889_v42, 16  ;;  %v1395_v49 = vrot.slane %v1393_v43, 4  ;;  %v1398_v10 = vrot.slane %v1396_v45, 5  ;;  %v2170_v53 = vld [vmem:[%s2268_s28 + $0x80] ss:$8 sps:$4 sm:$0xff]   ;;  %v1404_v54 = vrot.slane %v1402_v23, 5 }
  0x3e   : > { %1986 = vmatprep.mubr.msk.bf16.mxu1 %vm246_vm1, %v1787_v29  ;;  %v544_v1 = vsel %vm2308_vm4, %v539_v30, %v543_v26  ;;  %v553_v33 = vrot.slane %v552_v31, 4  ;;  %v1409_v55 = vrot.slane %v1407_v46, 4  ;;  %v1412_v56 = vrot.slane %v1410_v15, 5  ;;  %v2171_v5 = vld [vmem:[%s2268_s28 + $0xb0] ss:$8 sps:$4 sm:$0xff]  }
  0x3f   : > { %2027 = vmatmul.mubr.msk.bf16.gmra.mrb[4].mxu0 %vm246_vm1, %v2164_v62  ;;  %v1418_v57 = vrot.slane %v1416_v47, 5  ;;  %v1399_v59 = vor.u32 %v1398_v10, %v1395_v49  ;;  %v1421_v60 = vshrl.u32 %v1890_v48, 16  ;;  %v1424_v61 = vshll.u32 %v1890_v48, 16  ;;  %v1894_v17 = vld [vmem:[%s2268_s28 + $0x28] sm:$0xf] }
  0x40   : > { %2032 = vmatprep.mubr.msk.bf16.mxu0 %vm246_vm1, %v2165_v14  ;;  %v558_v36 = vsel %vm2308_vm4, %v553_v33, %v557_v32  ;;  %v1430_v62 = vshll.u32 %v1891_v50, 16  ;;  %v1413_v63 = vor.u32 %v1412_v56, %v1409_v55  ;;  %v1435_v0 = vshrl.u32 %v1892_v51, 16  ;;  %v1895_v20 = vld [vmem:[%s2268_s28 + $0x2c] sm:$0x1]  ;;  %v1896_v21 = vld [vmem:[%s2268_s28 + $0x30] sm:$0xf] }
  0x41   : > { %v1788_v38 = vcombine.low %v544_v1, %v558_v36  ;;  %v1438_v2 = vshll.u32 %v1892_v51, 16  ;;  %v1444_v4 = vshll.u32 %v1893_v58, 16  ;;  %v1400_v6 = vrot.slane %v1399_v59, 4  ;;  %v1897_v22 = vld [vmem:[%s2268_s28 + $0x34] sm:$0x1] }
  0x42   : > { %v1423_v7 = vrot.slane %v1421_v60, 4  ;;  %v1426_v8 = vrot.slane %v1424_v61, 5  ;;  %v1432_v9 = vrot.slane %v1430_v62, 5  ;;  %v1414_v11 = vrot.slane %v1413_v63, 4  ;;  %v2172_v32 = vld [vmem:[%s2268_s28 + $0xc0] ss:$8 sps:$4 sm:$0xff]  }
  0x43   : > { %1987 = vmatmul.mubr.msk.bf16.gmra.mrb[4].mxu1 %vm246_vm1, %v1788_v38  ;;  %v1437_v12 = vrot.slane %v1435_v0, 4  ;;  %v1440_v13 = vrot.slane %v1438_v2, 5  ;;  %v1446_v14 = vrot.slane %v1444_v4, 5  ;;  %v1405_v18 = vsel %vm2308_vm4, %v1400_v6, %v1404_v54  ;;  %v1898_v36 = vld [vmem:[%s2268_s28 + $0x38] sm:$0xf] }
  0x44   : > { %1992 = vmatprep.mubr.msk.bf16.mxu1 %vm246_vm1, %v2167_v37  ;;  %v1427_v19 = vor.u32 %v1426_v8, %v1423_v7  ;;  %v1419_v24 = vsel %vm2308_vm4, %v1414_v11, %v1418_v57  ;;  %v1449_v26 = vshrl.u32 %v1894_v17, 16  ;;  %v1452_v27 = vshll.u32 %v1894_v17, 16  ;;  %v1899_v16 = vld [vmem:[%s2268_s28 + $0x3c] sm:$0x1]  ;;  %v1900_v43 = vld [vmem:[%s2268_s28 + $0x40] sm:$0xf] }
  0x45   : > { %v1441_v25 = vor.u32 %v1440_v13, %v1437_v12  ;;  %v1903_v28 = vcombine.low %v1405_v18, %v1419_v24  ;;  %v1458_v30 = vshll.u32 %v1895_v20, 16  ;;  %v1463_v31 = vshrl.u32 %v1896_v21, 16  ;;  %v1901_v45 = vld [vmem:[%s2268_s28 + $0x44] sm:$0x1]  ;;  %v2173_v15 = vld [vmem:[%s2268_s28 + $0xf8] ss:$8 sps:$4 sm:$0xff]  }
  0x46   : > { %v1428_v29 = vrot.slane %v1427_v19, 4  ;;  %v1451_v33 = vrot.slane %v1449_v26, 4  ;;  %v1477_v23 = vshrl.u32 %v1898_v36, 16  ;;  %v1480_v48 = vshll.u32 %v1898_v36, 16  ;;  %v2174_v8 = vld [vmem:[%s2268_s28 + $0x108] ss:$8 sps:$4 sm:$0xff]  }
  0x47   : > { %2033 = vmatmul.mubr.msk.bf16.vlgmr.msra.gmra.mrb[0].mxu0 %vm246_vm1, %v2166_v35  ;;  %v1442_v1 = vrot.slane %v1441_v25, 4  ;;  %v1466_v35 = vshll.u32 %v1896_v21, 16  ;;  %v1460_v37 = vrot.slane %v1458_v30, 5  ;;  %v1465_v38 = vrot.slane %v1463_v31, 4  ;;  %v1911_v18 = vld [vmem:[%s2517_s2] ss:$0 sm:$0xff] }
  0x48   : > { %2041 = vmatpush3.bf16.msra.mxu0 %v1531_v34  ;;  %2036 = vmatprep.mubr.msk.bf16.mxu0 %vm246_vm1, %v2169_v39  ;;  %v1454_v34 = vrot.slane %v1452_v27, 5  ;;  %v1472_v39 = vshll.u32 %v1897_v22, 16  ;;  %v1486_v49 = vshll.u32 %v1899_v16, 16  ;;  %v1479_v51 = vrot.slane %v1477_v23, 4 }
  0x49   : > { %v1447_v40 = vsel %vm2308_vm4, %v1442_v1, %v1446_v14  ;;  %v1468_v42 = vrot.slane %v1466_v35, 5  ;;  %v1494_v54 = vshll.u32 %v1900_v43, 16  ;;  %v1500_v55 = vshll.u32 %v1901_v45, 16 }
  0x4a   : > { %v1455_v41 = vor.u32 %v1454_v34, %v1451_v33  ;;  %v1474_v47 = vrot.slane %v1472_v39, 5  ;;  %v1488_v60 = vrot.slane %v1486_v49, 5 }
  0x4b   : > { %1993 = vmatmul.mubr.msk.bf16.vlgmr.msra.gmra.mrb[0].mxu1 %vm246_vm1, %v2168_v52  ;;  %v1469_v50 = vor.u32 %v1468_v42, %v1465_v38  ;;  %v1491_v52 = vshrl.u32 %v1900_v43, 16  ;;  %v1496_v61 = vrot.slane %v1494_v54, 5  ;;  %v1502_v4 = vrot.slane %v1500_v55, 5 }
  0x4c   : > { %2051 = vmatpush3.bf16.msra.mxu1 %v2254_v3  ;;  %1996 = vmatprep.mubr.msk.bf16.mxu1 %vm246_vm1, %v2171_v5  ;;  %v1433_v3 = vsel %vm2308_vm4, %v1428_v29, %v1432_v9  ;;  %v1456_v10 = vrot.slane %v1455_v41, 4 }
  0x4d   : > { %v1904_v46 = vcombine.low %v1433_v3, %v1447_v40  ;;  %v1470_v57 = vrot.slane %v1469_v50, 4  ;;  %v1493_v58 = vrot.slane %v1491_v52, 4 }
  0x4e   : > { %v1461_v56 = vsel %vm2308_vm4, %v1456_v10, %v1460_v37 }
  0x4f   : > { %2037 = vmatmul.mubr.msk.bf16.gmra.mrb[4].mxu0 %vm246_vm1, %v2170_v53  ;;  %v1482_v53 = vrot.slane %v1480_v48, 5  ;;  %v1475_v62 = vsel %vm2308_vm4, %v1470_v57, %v1474_v47  ;;  %v1497_v2 = vor.u32 %v1496_v61, %v1493_v58 }
  0x50   : > { %2042 = vmatprep.mubr.msk.bf16.mxu0 %vm246_vm1, %v1903_v28  ;;  %v1905_v63 = vcombine.low %v1461_v56, %v1475_v62 }
  0x51   : > { %v1483_v59 = vor.u32 %v1482_v53, %v1479_v51  ;;  %v1498_v6 = vrot.slane %v1497_v2, 4 }
  0x53   : > { %1997 = vmatmul.mubr.msk.bf16.gmra.mrb[4].mxu1 %vm246_vm1, %v2172_v32  ;;  %v1484_v0 = vrot.slane %v1483_v59, 4  ;;  %v1503_v7 = vsel %vm2308_vm4, %v1498_v6, %v1502_v4 }
  0x54   : > { %2006 = vmatprep.mubr.msk.bf16.mxu1 %vm246_vm1, %v2173_v15 }
  0x55   : > { %v1489_v5 = vsel %vm2308_vm4, %v1484_v0, %v1488_v60 }
  0x56   : > { %v1906_v9 = vcombine.low %v1489_v5, %v1503_v7 }
  0x57   : > { %2043 = vmatmul.mubr.msk.bf16.vlgmr.msra.gmra.mrb[0].mxu0 %vm246_vm1, %v1904_v46 }
  0x58   : > { %2046 = vmatprep.mubr.msk.bf16.mxu0 %vm246_vm1, %v1905_v63 }
  0x5f   : > { %2047 = vmatmul.mubr.msk.bf16.gmra.mrb[4].mxu0 %vm246_vm1, %v1906_v9  ;;  %2007 = vmatmul.mubr.msk.bf16.vlgmr.msra.gmra.mrb[4].mxu1 %vm246_vm1, %v2174_v8 }
 0x11e   : > { %v1994_v11 = vpop.f32.mrb[0].mxu1 }
 0x11f   : > { %v743_v12 = vpop.f32.mrb[1].mxu1 }
 0x120   : > { %v1995_v13 = vpop.f32.mrb[2].mxu1 }
 0x121   : > { %v746_v14 = vpop.f32.mrb[3].mxu1 }
 0x12a   : > { %v2044_v17 = vpop.f32.mrb[0].mxu0 }
 0x12b   : > { %v2052_v19 = vadd.f32 %v2044_v17, %v1994_v11  ;;  %v1567_v44 = vpop.f32.mrb[1].mxu0 }
 0x12c   : > { %v2053_v20 = vadd.f32 %v1567_v44, %v743_v12  ;;  %v2045_v21 = vpop.f32.mrb[2].mxu0 }
 0x12d   : > { %v1615_v22 = vadd.f32 %v2052_v19, %v1911_v18  ;;  %v2054_v24 = vadd.f32 %v2045_v21, %v1995_v13  ;;  %v1570_v25 = vpop.f32.mrb[3].mxu0 }
 0x12e   : > { %v1613_v26 = vadd.f32 %v2053_v20, %v1911_v18  ;;  %v2055_v27 = vadd.f32 %v1570_v25, %v746_v14 }
 0x12f   : > { %v1623_v28 = vmax.f32 %v1615_v22, 0.0  ;;  %v1616_v29 = vadd.f32 %v2054_v24, %v1911_v18 }
 0x130   : > { %v1621_v30 = vmax.f32 %v1613_v26, 0.0  ;;  %v1614_v31 = vadd.f32 %v2055_v27, %v1911_v18 }
 0x131   : > { %v1631_v32 = vpack.c.bf16 %v1623_v28, %v1623_v28  ;;  %v1624_v1 = vmax.f32 %v1616_v29, 0.0 }
 0x132   : > { %v1629_v33 = vpack.c.bf16 %v1621_v30, %v1621_v30  ;;  %v1622_v34 = vmax.f32 %v1614_v31, 0.0  ;;  %v2048_v3 = vpop.f32.mrb[4].mxu0  ;;  %v2008_v38 = vpop.f32.mrb[4].mxu1 }
 0x133   : > { %1640 = vst.msk [vmem:[%s2488_s21 + $0x8] sm:$0xf] %vm1637_vm5, %v1631_v32  ;;  %v1632_v35 = vpack.c.bf16 %v1624_v1, %v1624_v1  ;;  %v1583_v37 = vpop.f32.mrb[5].mxu0  ;;  %v2056_v16 = vadd.f32 %v2048_v3, %v2008_v38  ;;  %v880_v40 = vpop.f32.mrb[5].mxu1 }
 0x134   : > { %1638 = vst.msk [vmem:[%s2488_s21] sm:$0xf] %vm1637_vm5, %v1629_v33  ;;  %v1630_v36 = vpack.c.bf16 %v1622_v34, %v1622_v34  ;;  %v2049_v39 = vpop.f32.mrb[6].mxu0  ;;  %v2057_v42 = vadd.f32 %v1583_v37, %v880_v40  ;;  %v2009_v43 = vpop.f32.mrb[6].mxu1 }
 0x135   : > { %1641 = vst.msk [vmem:[%s2488_s21 + $0xc] sm:$0xf] %vm1637_vm5, %v1632_v35  ;;  %v1586_v41 = vpop.f32.mrb[7].mxu0  ;;  %v1619_v45 = vadd.f32 %v2056_v16, %v1911_v18  ;;  %v2058_v23 = vadd.f32 %v2049_v39, %v2009_v43  ;;  %v883_v46 = vpop.f32.mrb[7].mxu1 }
 0x136   : > { %1639 = vst.msk [vmem:[%s2488_s21 + $0x4] sm:$0xf] %vm1637_vm5, %v1630_v36  ;;  %v1617_v15 = vadd.f32 %v2057_v42, %v1911_v18  ;;  %v2059_v47 = vadd.f32 %v1586_v41, %v883_v46 }
 0x137   : > { %v1627_v48 = vmax.f32 %v1619_v45, 0.0  ;;  %v1620_v49 = vadd.f32 %v2058_v23, %v1911_v18 }
 0x138   : > { %v1625_v10 = vmax.f32 %v1617_v15, 0.0  ;;  %v1618_v50 = vadd.f32 %v2059_v47, %v1911_v18 }
 0x139   : > { %v1635_v51 = vpack.c.bf16 %v1627_v48, %v1627_v48  ;;  %v1628_v52 = vmax.f32 %v1620_v49, 0.0 }
 0x13a   : > { %v1633_v53 = vpack.c.bf16 %v1625_v10, %v1625_v10  ;;  %v1626_v54 = vmax.f32 %v1618_v50, 0.0 }
 0x13b   : > { %1644 = vst.msk [vmem:[%s2488_s21 + $0x18] sm:$0xf] %vm1637_vm5, %v1635_v51  ;;  %v1636_v55 = vpack.c.bf16 %v1628_v52, %v1628_v52 }
 0x13c   : > { %1642 = vst.msk [vmem:[%s2488_s21 + $0x10] sm:$0xf] %vm1637_vm5, %v1633_v53  ;;  %v1634_v56 = vpack.c.bf16 %v1626_v54, %v1626_v54 }
 0x13d   : > { %1645 = vst.msk [vmem:[%s2488_s21 + $0x1c] sm:$0xf] %vm1637_vm5, %v1636_v55 }
 0x13e   : > { %1643 = vst.msk [vmem:[%s2488_s21 + $0x14] sm:$0xf] %vm1637_vm5, %v1634_v56 }
 0x13f PF: > { %s13_s14 = sadd.s32 1, %s2197_s14   ;;  %s2521_s12 = smov %s2193_s13 }
 0x140   : > { %p10_p6 = scmp.ge.s32.totalorder %s13_s14, 4   ;;  %s2522_s13 = smov %s2524_s15 }
 0x142   :  { %12 = sbr.rel (!%p10_p6) target bundleno = 2 (0x2), region = 76 }

// kernel: conv_seq_forward.3
= control target key start
LH: loop header
LB: loop body
LE: loop exit
PB: predicated region body
PF: predicated region fallthrough
CT: control target
= control target key end

     0   :  { %8 = vsyncpa [#allocation3], 0  ;;  %s3025_s0 = inlined_call_operand.vmem [shape: bf16[2,10,10,8], index: 0, kind: input, shape index: {}]   ;;  %s3026_s1 = inlined_call_operand.vmem [shape: bf16[9,8,16], index: 1, kind: input, shape index: {}]   ;;  %s3027_s2 = inlined_call_operand.vmem [shape: f32[1,16], index: 2, kind: input, shape index: {}]   ;;  %s3028_s3 = inlined_call_operand.hbm [shape: f32[2,8,8,16], index: 3, kind: output, shape index: {}]  }
   0x1   :  { %10 = vsyncpa [#allocation3 + $0x1], 0  ;;  %s2395_s12 = smov 0   ;;  %s2397_s13 = smov 0  }
   0x2   :  { %s2399_s14 = smov 0   ;;  %s2401_s15 = smov 0  }
   0x3   :  { %s2403_s16 = smov 0   ;;  %s2405_s17 = smov 0  }
   0x4 LB: > { %s1829_s18 = sadd.s32 4294967295, %s2370_s17   ;;  %s1830_s19 = sadd.s32 4294967294, %s2370_s17   ;;  %s2370_s17 = sphi %s2405_s17, %s16_s17   ;;  %s2366_s16 = sphi %s2403_s16, %s3039_s16   ;;  %s2362_s15 = sphi %s2401_s15, %s3038_s15   ;;  %s2358_s14 = sphi %s2399_s14, %s3037_s14   ;;  %s2354_s13 = sphi %s2397_s13, %s3036_s13   ;;  %s2350_s12 = sphi %s2395_s12, %s3035_s12  }
   0x5   : > { %s28_s20 = sadd.s32 1, %s2366_s16  ;;  %s105_s21 = sadd.s32 1, %s2358_s14 }
   0x6   : > { %p30_p0 = scmp.ge.s32.totalorder %s28_s20, 2  ;;  %p115_p1 = scmp.ne.s32.totalorder %s2358_s14, %s2354_s13 }
   0x7   : > { %p116_p2 = scmp.eq.s32.totalorder %s1829_s18, 1  ;;  %p121_p3 = scmp.ne.s32.totalorder %s2354_s13, %s2350_s12 }
   0x8   : > { %s3041_s20 = smov (%p30_p0, %s28_s20), 0  ;;  %p122_p5 = scmp.eq.s32.totalorder %s1830_s19, 1 }
   0x9   : > { %p2435_p4 = por %p116_p2, %p115_p1  ;;  %s100_s23 = ssub.s32 %s2366_s16, %s3041_s20 }
   0xa   : > { %p1833_p6 = scmp.ge.s32.totalorder %s2370_s17, 1  ;;  %p103_p7 = scmp.eq.s32.totalorder %s100_s23, 0 }
   0xb   : > { %p2442_p8 = por %p122_p5, %p121_p3  ;;  %p154_p9 = scmp.lt.s32.totalorder %s2370_s17, 3 }
   0xc   : > { %s2448_s25 = scalar_select %p103_p7, %s2358_s14, %s105_s21  }
   0xd   : > { %p155_p10 = pnand %p1833_p6, %p154_p9 }
   0xe   : > { %v1836_v0 = vld [vmem:[%s3026_s1 + $0x4] sm:$0xf] (!%p155_p10)  ;;  %vm348_vm0 = vcmask (!%p155_p10), 1043456   ;;  %v2456_v1 = vld [vmem:[%s3026_s1 + $0x10] sm:$0xf] (!%p155_p10)  ;;  %p178_p11 = scmp.lt.s32.totalorder (!%p155_p10), %s2362_s15, 1 }
   0xf   : > { %158 = sbr.rel (%p155_p10) target bundleno = 360 (0x168), region = 32  ;;  %2212 = vmatprep.subr.msk.bf16.mxu1 (!%p155_p10), %vm348_vm0, %v1836_v0  ;;  %2216 = vmatprep.subr.msk.bf16.mxu0 (!%p155_p10), %vm348_vm0, %v2456_v1  ;;  %v350_v2 = vsel (!%p155_p10), %vm348_vm0, %v1836_v0, 0  ;;  %v2465_v3 = vsel (!%p155_p10), %vm348_vm0, %v2456_v1, 0  ;;  %v197_v4 = vld [vmem:[%s3026_s1] sm:$0xf] (!%p155_p10)  ;;  %vm335_vm3 = vcmask (!%p155_p10), 64512  }
  0x10   : > { %2057 = vmatpush3.bf16.msra.mxu1 (!%p155_p10), %v350_v2  ;;  %2097 = vmatpush3.bf16.msra.mxu0 (!%p155_p10), %v2465_v3  ;;  %v1928_v5 = vld [vmem:[%s3026_s1 + $0x14] sm:$0xf] (!%p155_p10)  ;;  %vm206_vm1 = vsmask.f32 (!%p155_p10), 3328  ;;  %vm207_vm2 = vsmask.f32 (!%p155_p10), 7440 }
  0x11   : > { %2213 = vmatprep.subr.msk.bf16.mxu1 (!%p155_p10), %vm348_vm0, %v197_v4  ;;  %2218 = vmatprep.subr.msk.bf16.mxu0 (!%p155_p10), %vm348_vm0, %v1928_v5  ;;  %v2502_v17 = vsel (!%p155_p10), %vm348_vm0, %v197_v4, 0  ;;  %v2515_v31 = vld [vmem:[%s3026_s1 + $0x18] sm:$0xf] (!%p155_p10)  ;;  %vm2519_vm4 = vmor (!%p155_p10), %vm206_vm1, %vm207_vm2  ;;  %v2531_v42 = vsel (!%p155_p10), %vm348_vm0, %v1928_v5, 0  ;;  %vm541_vm5 = vcmask (!%p155_p10), 1042432   ;;  %vm542_vm6 = vcmask (!%p155_p10), 1046532  }
  0x12   : > { %v2538_v47 = vsel (!%p155_p10), %vm348_vm0, %v2515_v31, 0  ;;  %vm2630_vm7 = vmor (!%p155_p10), %vm541_vm5, %vm542_vm6  ;;  %s175_s5 = sand.u32 (!%p155_p10), 1, %s2354_s13   ;;  %vm1721_vm8 = vcmask (!%p155_p10), 130048   ;;  %s2010_s10 = sshll.u32 (!%p155_p10), %s2362_s15, 10 }
  0x13   : > { %s2967_s21 = scalar_lea.hbm (!%p155_p10), %s3028_s3, %s2010_s10  ;;  %s2372_s26 = smov (!%p155_p10), [#allocation2]  }
  0x14   : > { %s2296_s27 = sshll.u32 (!%p155_p10), %s2372_s26, 4  ;;  %s2297_s27 = int_to_ptr.vmem [resolvable:$false] %s2296_s27 }
  0x15   : > { %s2298_s28 = scalar_lea.vmem (!%p155_p10), %s2297_s27, 2048 }
  0x16   : > { %s179_s30 = scalar_select %p178_p11, %s2362_s15, 1 }
  0x17   : > { %s2979_s15 = scalar_lea.sflag [#allocation3], %s175_s5 }
  0x18   : > { %s2222_s8 = smul.u32 80, %s179_s30 }
  0x1a   : > { %s2480_s11 = scalar_lea.vmem %s3025_s0, %s2222_s8  ;;  %s1834_s8 = sshll.u32 %s175_s5, 6 }
  0x1b   : > { %v2483_v6 = vld [vmem:[%s2480_s11] sm:$0xf]  ;;  %v2486_v7 = vld [vmem:[%s2480_s11 + $0x8] sm:$0xf]  ;;  %v2489_v8 = vld [vmem:[%s2480_s11 + $0x4] sm:$0x1] }
  0x1c   : > { %v2492_v9 = vld [vmem:[%s2480_s11 + $0xc] sm:$0x1]  ;;  %v210_v10 = vshrl.u32 %v2483_v6, 16  ;;  %v213_v11 = vshll.u32 %v2483_v6, 16  ;;  %v219_v12 = vshll.u32 %v2489_v8, 16  ;;  %v224_v13 = vshrl.u32 %v2486_v7, 16 }
  0x1d   : > { %v227_v14 = vshll.u32 %v2486_v7, 16  ;;  %v233_v15 = vshll.u32 %v2492_v9, 16  ;;  %v1887_v16 = vld [vmem:[%s2480_s11 + $0x8] sm:$0xf]  ;;  %v2505_v22 = vld [vmem:[%s2480_s11 + $0xc] sm:$0x1] }
  0x1e   : > { %v212_v18 = vrot.slane %v210_v10, 4  ;;  %v215_v19 = vrot.slane %v213_v11, 5  ;;  %v221_v20 = vrot.slane %v219_v12, 5  ;;  %v226_v21 = vrot.slane %v224_v13, 4  ;;  %v1889_v25 = vld [vmem:[%s2480_s11 + $0x10] sm:$0xf] }
  0x1f   : > { %v229_v23 = vrot.slane %v227_v14, 5  ;;  %v235_v24 = vrot.slane %v233_v15, 5  ;;  %v2509_v26 = vld [vmem:[%s2480_s11 + $0x14] sm:$0x1]  ;;  %v817_v28 = vshrl.u32 %v1887_v16, 16  ;;  %v820_v29 = vshll.u32 %v1887_v16, 16 }
  0x20   : > { %v216_v27 = vor.u32 %v215_v19, %v212_v18  ;;  %v826_v30 = vshll.u32 %v2505_v22, 16  ;;  %v831_v34 = vshrl.u32 %v1889_v25, 16  ;;  %v834_v35 = vshll.u32 %v1889_v25, 16  ;;  %v2525_v37 = vld [vmem:[%s2480_s11 + $0x10] sm:$0xf]  ;;  %s2950_s9 = scalar_lea.vmem [#allocation2], %s1834_s8 }
  0x21   : > { %v230_v33 = vor.u32 %v229_v23, %v226_v21  ;;  %v840_v36 = vshll.u32 %v2509_v26, 16  ;;  %v819_v39 = vrot.slane %v817_v28, 4  ;;  %v822_v40 = vrot.slane %v820_v29, 5  ;;  %v2528_v41 = vld [vmem:[%s2480_s11 + $0x18] sm:$0xf] }
  0x22   : > { %v217_v38 = vrot.slane %v216_v27, 4  ;;  %v833_v44 = vrot.slane %v831_v34, 4  ;;  %v836_v45 = vrot.slane %v834_v35, 5  ;;  %v2534_v46 = vld [vmem:[%s2480_s11 + $0x14] sm:$0x1]  ;;  %v828_v50 = vrot.slane %v826_v30, 5 }
  0x23   : > { %v231_v43 = vrot.slane %v230_v33, 4  ;;  %v823_v49 = vor.u32 %v822_v40, %v819_v39  ;;  %v842_v51 = vrot.slane %v840_v36, 5  ;;  %v2545_v54 = vld [vmem:[%s2480_s11 + $0x1c] sm:$0x1]  ;;  %v238_v55 = vshrl.u32 %v2525_v37, 16 }
  0x24   : > { %v222_v48 = vsel %vm2519_vm4, %v217_v38, %v221_v20  ;;  %v837_v53 = vor.u32 %v836_v45, %v833_v44  ;;  %v241_v56 = vshll.u32 %v2525_v37, 16  ;;  %v247_v59 = vshll.u32 %v2534_v46, 16  ;;  %v1891_v2 = vld [vmem:[%s2480_s11 + $0x18] sm:$0xf]  ;;  %v2559_v12 = vld [vmem:[%s2480_s11 + $0x1c] sm:$0x1] }
  0x25   : > { %v236_v52 = vsel %vm2519_vm4, %v231_v43, %v235_v24  ;;  %v824_v58 = vrot.slane %v823_v49, 4  ;;  %v252_v60 = vshrl.u32 %v2528_v41, 16  ;;  %v240_v62 = vrot.slane %v238_v55, 4  ;;  %v1893_v18 = vld [vmem:[%s2480_s11 + $0x20] sm:$0xf] }
  0x26   : > { %v1837_v57 = vcombine.low %v222_v48, %v236_v52  ;;  %v838_v61 = vrot.slane %v837_v53, 4  ;;  %v243_v63 = vrot.slane %v241_v56, 5  ;;  %v255_v0 = vshll.u32 %v2528_v41, 16  ;;  %v2565_v19 = vld [vmem:[%s2480_s11 + $0x24] sm:$0x1] }
  0x27   : > { %v829_v4 = vsel %vm2519_vm4, %v824_v58, %v828_v50  ;;  %v1056_v5 = vrot.slane %v2505_v22, 5  ;;  %v254_v10 = vrot.slane %v252_v60, 4  ;;  %v261_v11 = vshll.u32 %v2545_v54, 16  ;;  %v2572_v36 = vld [vmem:[%s2480_s11 + $0x20] sm:$0xf] }
  0x28   : > { %2058 = vmatprep.mubr.msk.bf16.mxu1 %vm335_vm3, %v1837_v57  ;;  %v843_v13 = vsel %vm2519_vm4, %v838_v61, %v842_v51  ;;  %v244_v14 = vor.u32 %v243_v63, %v240_v62  ;;  %v249_v15 = vrot.slane %v247_v59, 5  ;;  %v257_v16 = vrot.slane %v255_v0, 5  ;;  %v2577_v44 = vld [vmem:[%s2480_s11 + $0x24] sm:$0x1]  ;;  %v2581_v51 = vld [vmem:[%s2480_s11 + $0x28] sm:$0xf] }
  0x29   : > { %v1904_v20 = vcombine.low %v829_v4, %v843_v13  ;;  %v1060_v21 = vrot.slane %v2509_v26, 5  ;;  %v263_v23 = vrot.slane %v261_v11, 5  ;;  %v845_v24 = vshrl.u32 %v1891_v2, 16  ;;  %v2587_v56 = vld [vmem:[%s2480_s11 + $0x2c] sm:$0x1] }
  0x2a   : > { %v245_v25 = vrot.slane %v244_v14, 4  ;;  %v258_v27 = vor.u32 %v257_v16, %v254_v10  ;;  %v848_v28 = vshll.u32 %v1891_v2, 16  ;;  %v854_v29 = vshll.u32 %v2559_v12, 16  ;;  %v2593_v62 = vld [vmem:[%s2480_s11 + $0x30] sm:$0xf] }
  0x2b   : > { %2098 = vmatprep.mubr.msk.bf16.mxu0 %vm335_vm3, %v1904_v20  ;;  %v847_v30 = vrot.slane %v845_v24, 4  ;;  %v859_v33 = vshrl.u32 %v1893_v18, 16  ;;  %v862_v34 = vshll.u32 %v1893_v18, 16  ;;  %v868_v35 = vshll.u32 %v2565_v19, 16  ;;  %v2598_v63 = vld [vmem:[%s3026_s1 + $0x8] sm:$0xf] }
  0x2c   : > { %v250_v38 = vsel %vm2519_vm4, %v245_v25, %v249_v15  ;;  %v259_v39 = vrot.slane %v258_v27, 4  ;;  %v850_v40 = vrot.slane %v848_v28, 5  ;;  %v856_v43 = vrot.slane %v854_v29, 5  ;;  %v2603_v11 = vld [vmem:[%s2480_s11 + $0x38] sm:$0xf] }
  0x2d   : > { %v861_v45 = vrot.slane %v859_v33, 4  ;;  %v864_v48 = vrot.slane %v862_v34, 5  ;;  %v870_v49 = vrot.slane %v868_v35, 5  ;;  %v1064_v50 = vrot.slane %v2559_v12, 5  ;;  %v2608_v18 = vld [vmem:[%s2480_s11 + $0x34] sm:$0x1] }
  0x2e   : > { %v264_v52 = vsel %vm2519_vm4, %v259_v39, %v263_v23  ;;  %v851_v53 = vor.u32 %v850_v40, %v847_v30  ;;  %v1068_v55 = vrot.slane %v2565_v19, 5  ;;  %v266_v57 = vshrl.u32 %v2572_v36, 16  ;;  %v2614_v25 = vld [vmem:[%s2480_s11 + $0x3c] sm:$0x1]  ;;  %v1912_v34 = vld [vmem:[%s2480_s11 + $0x8] sm:$0xe] }
  0x2f   : > { %v1838_v58 = vcombine.low %v250_v38, %v264_v52  ;;  %v865_v59 = vor.u32 %v864_v48, %v861_v45  ;;  %v269_v60 = vshll.u32 %v2572_v36, 16  ;;  %v275_v61 = vshll.u32 %v2577_v44, 16  ;;  %v2683_v19 = vld [vmem:[%s2480_s11 + $0x44] sm:$0x1] }
  0x30   : > { %v852_v0 = vrot.slane %v851_v53, 4  ;;  %v268_v2 = vrot.slane %v266_v57, 4  ;;  %v280_v4 = vshrl.u32 %v2581_v51, 16  ;;  %v283_v10 = vshll.u32 %v2581_v51, 16  ;;  %v1915_v57 = vld [vmem:[%s2480_s11 + $0x20] sm:$0xe] }
  0x31   : > { %2059 = vmatmul.mubr.msk.bf16.vlgmr.msra.gmra.mrb[0].mxu1 %vm335_vm3, %v1838_v58  ;;  %v866_v13 = vrot.slane %v865_v59, 4  ;;  %v271_v14 = vrot.slane %v269_v60, 5  ;;  %v277_v15 = vrot.slane %v275_v61, 5  ;;  %v289_v16 = vshll.u32 %v2587_v56, 16  ;;  %v2004_v53 = vld [vmem:[%s3027_s2] ss:$0 sm:$0xff] }
  0x32   : > { %2067 = vmatpush3.bf16.msra.mxu1 %v2502_v17  ;;  %v857_v20 = vsel %vm2519_vm4, %v852_v0, %v856_v43  ;;  %v282_v23 = vrot.slane %v280_v4, 4  ;;  %v285_v24 = vrot.slane %v283_v10, 5  ;;  %v294_v27 = vshrl.u32 %v2593_v62, 16  ;;  %v1913_v17 = vld [vmem:[%s2480_s11 + $0x10] sm:$0xe] }
  0x33   : > { %v871_v28 = vsel %vm2519_vm4, %v866_v13, %v870_v49  ;;  %v272_v29 = vor.u32 %v271_v14, %v268_v2  ;;  %v291_v30 = vrot.slane %v289_v16, 5  ;;  %v297_v33 = vshll.u32 %v2593_v62, 16  ;;  %2214 = vmatprep.subr.msk.bf16.mxu1 %vm348_vm0, %v2598_v63  ;;  %v1914_v43 = vld [vmem:[%s2480_s11 + $0x18] sm:$0xe]  ;;  %v1916_v0 = vld [vmem:[%s2480_s11 + $0x28] sm:$0xe] }
  0x34   : > { %v1905_v35 = vcombine.low %v857_v20, %v871_v28  ;;  %v286_v38 = vor.u32 %v285_v24, %v282_v23  ;;  %v296_v39 = vrot.slane %v294_v27, 4  ;;  %v303_v40 = vshll.u32 %v2608_v18, 16 }
  0x35   : > { %v273_v45 = vrot.slane %v272_v29, 4  ;;  %v299_v48 = vrot.slane %v297_v33, 5  ;;  %v308_v49 = vshrl.u32 %v2603_v11, 16  ;;  %v311_v52 = vshll.u32 %v2603_v11, 16  ;;  %v2653_v29 = vld [vmem:[%s2480_s11 + $0x34] sm:$0x1] }
  0x36   : > { %2099 = vmatmul.mubr.msk.bf16.vlgmr.msra.gmra.mrb[0].mxu0 %vm335_vm3, %v1905_v35  ;;  %v287_v58 = vrot.slane %v286_v38, 4  ;;  %v305_v59 = vrot.slane %v303_v40, 5  ;;  %v317_v60 = vshll.u32 %v2614_v25, 16  ;;  %v1920_v61 = vrot.slane %v1912_v34, 9  ;;  %v1918_v38 = vld [vmem:[%s2480_s11 + $0x38] sm:$0xe] }
  0x37   : > { %2107 = vmatpush3.bf16.msra.mxu0 %v2531_v42  ;;  %v278_v2 = vsel %vm2519_vm4, %v273_v45, %v277_v15  ;;  %v300_v4 = vor.u32 %v299_v48, %v296_v39  ;;  %v310_v10 = vrot.slane %v308_v49, 4  ;;  %v313_v13 = vrot.slane %v311_v52, 5  ;;  %v2650_v42 = vld [vmem:[%s2480_s11 + $0x2c] sm:$0x1]  ;;  %v1919_v45 = vld [vmem:[%s2480_s11 + $0x40] sm:$0xe] }
  0x38   : > { %v292_v14 = vsel %vm2519_vm4, %v287_v58, %v291_v30  ;;  %v319_v16 = vrot.slane %v317_v60, 5  ;;  %v1057_v20 = vsel %vm2630_vm7, %v1920_v61, %v1056_v5  ;;  %v1921_v23 = vrot.slane %v1913_v17, 9  ;;  %2219 = vmatprep.subr.msk.bf16.mxu0 %vm348_vm0, %v2515_v31  ;;  %v1917_v30 = vld [vmem:[%s2480_s11 + $0x30] sm:$0xe]  ;;  %v2661_v31 = vld [vmem:[%s2480_s11 + $0x3c] sm:$0x1] }
  0x39   : > { %v1839_v15 = vcombine.low %v278_v2, %v292_v14  ;;  %v301_v24 = vrot.slane %v300_v4, 4  ;;  %v314_v27 = vor.u32 %v313_v13, %v310_v10  ;;  %v1922_v28 = vrot.slane %v1914_v43, 9  ;;  %v2692_v48 = vld [vmem:[%s3026_s1 + $0xc] sm:$0xf]  ;;  %v518_v58 = vld [vmem:[%s2480_s11 + $0x8] sm:$0xe] }
  0x3a   : > { %v1061_v22 = vsel %vm2630_vm7, %v1921_v23, %v1060_v21  ;;  %v1923_v5 = vrot.slane %v1915_v57, 9  ;;  %v1924_v33 = vrot.slane %v1916_v0, 9  ;;  %v1072_v39 = vrot.slane %v2650_v42, 5  ;;  %v520_v4 = vld [vmem:[%s2480_s11 + $0x18] sm:$0xe] }
  0x3b   : > { %2062 = vmatprep.mubr.msk.bf16.mxu1 %vm335_vm3, %v1839_v15  ;;  %v306_v34 = vsel %vm2519_vm4, %v301_v24, %v305_v59  ;;  %v315_v17 = vrot.slane %v314_v27, 4  ;;  %v1929_v35 = vcombine.low %v1057_v20, %v1061_v22  ;;  %v1065_v26 = vsel %vm2630_vm7, %v1922_v28, %v1064_v50  ;;  %v519_v59 = vld [vmem:[%s2480_s11 + $0x10] sm:$0xe]  ;;  %v521_v20 = vld [vmem:[%s2480_s11 + $0x20] sm:$0xe] }
  0x3c   : > { %v1069_v21 = vsel %vm2630_vm7, %v1923_v5, %v1068_v55  ;;  %v1925_v40 = vrot.slane %v1917_v30, 9  ;;  %v1076_v43 = vrot.slane %v2653_v29, 5  ;;  %v1845_v50 = vcombine.low %v2483_v6, %v2486_v7  ;;  %v1970_v55 = vld [vmem:[%s3026_s1 + $0x1c] sm:$0xf]  ;;  %v517_v7 = vld [vmem:[%s2480_s11] sm:$0xe] }
  0x3d   : > { %v320_v12 = vsel %vm2519_vm4, %v315_v17, %v319_v16  ;;  %2108 = vmatprep.mubr.msk.bf16.mxu0 %vm335_vm3, %v1929_v35  ;;  %v1930_v52 = vcombine.low %v1065_v26, %v1069_v21  ;;  %v1073_v57 = vsel %vm2630_vm7, %v1924_v33, %v1072_v39  ;;  %v546_v60 = vrot.slane %v2489_v8, 5  ;;  %v1954_v5 = vld [vmem:[%s2480_s11 + $0x10] sm:$0xf]  ;;  %v522_v17 = vld [vmem:[%s2480_s11 + $0x28] sm:$0xe] }
  0x3e   : > { %v1840_v49 = vcombine.low %v306_v34, %v320_v12  ;;  %v1077_v6 = vsel %vm2630_vm7, %v1925_v40, %v1076_v43  ;;  %v1926_v0 = vrot.slane %v1918_v38, 9  ;;  %v1080_v2 = vrot.slane %v2661_v31, 5  ;;  %v523_v35 = vld [vmem:[%s2480_s11 + $0x30] sm:$0xe]  ;;  %v1956_v26 = vld [vmem:[%s2480_s11 + $0x18] sm:$0xf] }
  0x3f   : > { %v1931_v61 = vcombine.low %v1073_v57, %v1077_v6  ;;  %v550_v10 = vrot.slane %v2492_v9, 5  ;;  %v554_v13 = vrot.slane %v2534_v46, 5  ;;  %v1927_v14 = vrot.slane %v1919_v45, 9  ;;  %v2284_v38 = vld [vmem:[%s2480_s11 + $0x10] ss:$8 sps:$4 sm:$0xff]  }
  0x40   : > { %2063 = vmatmul.mubr.msk.bf16.gmra.mrb[4].mxu1 %vm335_vm3, %v1840_v49  ;;  %v1084_v16 = vrot.slane %v2683_v19, 5  ;;  %v558_v23 = vrot.slane %v2545_v54, 5  ;;  %v1853_v8 = vrot.slane %v517_v7, 9  ;;  %v1854_v15 = vrot.slane %v518_v58, 9  ;;  %v2755_v21 = vld [vmem:[%s2480_s11 + $0x38] sm:$0xe] }
  0x41   : > { %2068 = vmatprep.mubr.msk.bf16.mxu1 %vm335_vm3, %v1845_v50  ;;  %v1855_v24 = vrot.slane %v519_v59, 9  ;;  %v603_v9 = vsel %vm348_vm0, %v2598_v63, 0  ;;  %v2715_v46 = vsel %vm348_vm0, %v1970_v55, 0  ;;  %v1856_v27 = vrot.slane %v520_v4, 9  ;;  %v2758_v39 = vld [vmem:[%s2480_s11 + $0x14] sm:$0x1] }
  0x42   : > { %2109 = vmatmul.mubr.msk.bf16.vlgmr.msra.gmra.mrb[0].mxu0 %vm335_vm3, %v1930_v52  ;;  %v2719_v54 = vsel %vm348_vm0, %v2692_v48, 0  ;;  %v1081_v28 = vsel %vm2630_vm7, %v1926_v0, %v1080_v2  ;;  %v1085_v63 = vsel %vm2630_vm7, %v1927_v14, %v1084_v16  ;;  %v1857_v30 = vrot.slane %v521_v20, 9  ;;  %v1960_v52 = vld [vmem:[%s2480_s11 + $0x28] sm:$0xf]  ;;  %v2777_v59 = vld [vmem:[%s2480_s11 + $0x1c] sm:$0x1] }
  0x43   : > { %2117 = vmatpush3.bf16.msra.mxu0 %v2538_v47  ;;  %2112 = vmatprep.mubr.msk.bf16.mxu0 %vm335_vm3, %v1931_v61  ;;  %v562_v22 = vrot.slane %v2577_v44, 5  ;;  %v1846_v33 = vcombine.low %v2525_v37, %v2528_v41  ;;  %v2734_v47 = vsel %vm2630_vm7, %v1853_v8, %v546_v60  ;;  %v2738_v34 = vsel %vm2630_vm7, %v1854_v15, %v550_v10  ;;  %v2785_v2 = vld [vmem:[%s2480_s11 + $0x24] sm:$0x1]  ;;  %v1962_v20 = vld [vmem:[%s2480_s11 + $0x30] sm:$0xf] }
  0x44   : > { %2220 = vmatprep.subr.msk.bf16.mxu0 %vm348_vm0, %v1970_v55  ;;  %v1847_v44 = vcombine.low %v2572_v36, %v2581_v51  ;;  %v2748_v37 = vsel %vm2630_vm7, %v1855_v24, %v554_v13  ;;  %v2752_v41 = vsel %vm2630_vm7, %v1856_v27, %v558_v23  ;;  %v1932_v40 = vcombine.low %v1081_v28, %v1085_v63  ;;  %v1958_v36 = vld [vmem:[%s2480_s11 + $0x20] sm:$0xf]  ;;  %v2796_v15 = vld [vmem:[%s2480_s11 + $0x2c] sm:$0x1]  ;;  %v2286_v27 = vld [vmem:[%s2480_s11 + $0x30] ss:$8 sps:$4 sm:$0xff]  }
  0x45   : > { %v1848_v43 = vcombine.low %v2593_v62, %v2603_v11  ;;  %v1327_v12 = vshrl.u32 %v1954_v5, 16  ;;  %v1330_v50 = vshll.u32 %v1954_v5, 16  ;;  %v1862_v51 = vcombine.low %v2734_v47, %v2738_v34  ;;  %v2285_v23 = vld [vmem:[%s2480_s11 + $0x20] ss:$8 sps:$4 sm:$0xff]   ;;  %v1964_v5 = vld [vmem:[%s2480_s11 + $0x38] sm:$0xf] }
  0x46   : > { %v2767_v45 = vsel %vm2630_vm7, %v1857_v30, %v562_v22  ;;  %v1858_v55 = vrot.slane %v522_v17, 9  ;;  %v1341_v49 = vshrl.u32 %v1956_v26, 16  ;;  %v1863_v62 = vcombine.low %v2748_v37, %v2752_v41  ;;  %v2807_v17 = vld [vmem:[%s2480_s11 + $0x34] sm:$0x1] }
  0x47   : > { %v566_v11 = vrot.slane %v2587_v56, 5  ;;  %v1329_v57 = vrot.slane %v1327_v12, 4  ;;  %v1332_v6 = vrot.slane %v1330_v50, 5  ;;  %v1859_v7 = vrot.slane %v523_v35, 9  ;;  %v1966_v12 = vld [vmem:[%s2480_s11 + $0x40] sm:$0xf] }
  0x48   : > { %2069 = vmatmul.mubr.msk.bf16.vlgmr.msra.gmra.mrb[0].mxu1 %vm335_vm3, %v1846_v33  ;;  %v570_v58 = vrot.slane %v2608_v18, 5  ;;  %v1343_v60 = vrot.slane %v1341_v49, 4  ;;  %v1344_v61 = vshll.u32 %v1956_v26, 16  ;;  %v1860_v56 = vrot.slane %v2755_v21, 9  ;;  %v2817_v21 = vld [vmem:[%s2480_s11 + $0x3c] sm:$0x1] }
  0x49   : > { %2077 = vmatpush3.bf16.msra.mxu1 %v603_v9  ;;  %2072 = vmatprep.mubr.msk.bf16.mxu1 %vm335_vm3, %v1847_v44  ;;  %v1336_v0 = vshll.u32 %v2758_v39, 16  ;;  %v1355_v18 = vshrl.u32 %v1958_v36, 16  ;;  %v1358_v4 = vshll.u32 %v1958_v36, 16  ;;  %v1333_v10 = vor.u32 %v1332_v6, %v1329_v57  ;;  %v1968_v6 = vld [vmem:[%s2480_s11 + $0x48] sm:$0xf] }
  0x4a   : > { %2113 = vmatmul.mubr.msk.bf16.gmra.mrb[4].mxu0 %vm335_vm3, %v1932_v40  ;;  %2215 = vmatprep.subr.msk.bf16.mxu1 %vm348_vm0, %v2692_v48  ;;  %v1346_v13 = vrot.slane %v1344_v61, 5  ;;  %v1369_v14 = vshrl.u32 %v1960_v52, 16  ;;  %v1372_v16 = vshll.u32 %v1960_v52, 16  ;;  %v2792_v48 = vsel %vm2630_vm7, %v1858_v55, %v566_v11 }
  0x4b   : > { %2118 = vmatprep.mubr.msk.bf16.mxu0 %vm335_vm3, %v2284_v38  ;;  %v1350_v8 = vshll.u32 %v2777_v59, 16  ;;  %v1357_v24 = vrot.slane %v1355_v18, 4  ;;  %v1360_v9 = vrot.slane %v1358_v4, 5  ;;  %v574_v28 = vrot.slane %v2614_v25, 5  ;;  %v2814_v25 = vld [vmem:[%s3026_s1 + $0x20] sm:$0xf] }
  0x4c   : > { %v1347_v63 = vor.u32 %v1346_v13, %v1343_v60  ;;  %v1371_v30 = vrot.slane %v1369_v14, 4  ;;  %v1374_v22 = vrot.slane %v1372_v16, 5  ;;  %v2803_v33 = vsel %vm2630_vm7, %v1859_v7, %v570_v58  ;;  %v2842_v13 = vld [vmem:[%s2480_s11 + $0x44] sm:$0x1] }
  0x4d   : > { %v1338_v47 = vrot.slane %v1336_v0, 5  ;;  %v1364_v34 = vshll.u32 %v2785_v2, 16  ;;  %v1383_v35 = vshrl.u32 %v1962_v20, 16  ;;  %v1864_v26 = vcombine.low %v2767_v45, %v2792_v48 }
  0x4e   : > { %v1334_v44 = vrot.slane %v1333_v10, 4  ;;  %v1361_v38 = vor.u32 %v1360_v9, %v1357_v24  ;;  %v1386_v40 = vshll.u32 %v1962_v20, 16  ;;  %v1348_v50 = vrot.slane %v1347_v63, 4  ;;  %v2845_v20 = vld [vmem:[%s2480_s11 + $0x4c] sm:$0x1] }
  0x4f   : > { %v1352_v36 = vrot.slane %v1350_v8, 5  ;;  %v1385_v55 = vrot.slane %v1383_v35, 4  ;;  %v1397_v49 = vshrl.u32 %v1964_v5, 16  ;;  %v2824_v45 = vsel %vm2630_vm7, %v1860_v56, %v574_v28  ;;  %v2287_v8 = vld [vmem:[%s2480_s11 + $0x40] ss:$8 sps:$4 sm:$0xff]  }
  0x50   : > { %2073 = vmatmul.mubr.msk.bf16.gmra.mrb[4].mxu1 %vm335_vm3, %v1848_v43  ;;  %v1375_v52 = vor.u32 %v1374_v22, %v1371_v30  ;;  %v1378_v11 = vshll.u32 %v2796_v15, 16  ;;  %v1388_v57 = vrot.slane %v1386_v40, 5  ;;  %v2829_v7 = vrot.slane %v1364_v34, 5 }
  0x51   : > { %2078 = vmatprep.mubr.msk.bf16.mxu1 %vm335_vm3, %v1862_v51  ;;  %v1392_v43 = vshll.u32 %v2807_v17, 16  ;;  %v1399_v58 = vrot.slane %v1397_v49, 4  ;;  %v1400_v60 = vshll.u32 %v1964_v5, 16  ;;  %v1339_v51 = vsel %vm2519_vm4, %v1334_v44, %v1338_v47  ;;  %v1897_v49 = vld [vmem:[%s2480_s11 + $0x30] sm:$0xf] }
  0x52   : > { %2119 = vmatmul.mubr.msk.bf16.vlgmr.msra.gmra.mrb[0].mxu0 %vm335_vm3, %v2285_v23  ;;  %v1362_v61 = vrot.slane %v1361_v38, 4  ;;  %v1389_v56 = vor.u32 %v1388_v57, %v1385_v55  ;;  %v1411_v0 = vshrl.u32 %v1966_v12, 16  ;;  %v1353_v18 = vsel %vm2519_vm4, %v1348_v50, %v1352_v36  ;;  %v1979_v38 = vld [vmem:[%s2480_s11 + $0x10] sm:$0xe]  ;;  %v1980_v50 = vld [vmem:[%s2480_s11 + $0x18] sm:$0xe] }
  0x53   : > { %2127 = vmatpush3.bf16.msra.mxu0 %v2715_v46  ;;  %2122 = vmatprep.mubr.msk.bf16.mxu0 %vm335_vm3, %v2286_v27  ;;  %v1402_v4 = vrot.slane %v1400_v60, 5  ;;  %v1406_v10 = vshll.u32 %v2817_v21, 16  ;;  %v1414_v46 = vshll.u32 %v1966_v12, 16  ;;  %v1376_v14 = vrot.slane %v1375_v52, 4  ;;  %v2288_v57 = vld [vmem:[%s2480_s11 + $0x8] ss:$8 sps:$4 sm:$0xff]  }
  0x54   : > { %2221 = vmatprep.subr.msk.bf16.mxu0 %vm348_vm0, %v2814_v25  ;;  %v1380_v16 = vrot.slane %v1378_v11, 5  ;;  %v1413_v23 = vrot.slane %v1411_v0, 4  ;;  %v1425_v48 = vshrl.u32 %v1968_v6, 16  ;;  %v1394_v24 = vrot.slane %v1392_v43, 5 }
  0x55   : > { %v1403_v9 = vor.u32 %v1402_v4, %v1399_v58  ;;  %v1416_v27 = vrot.slane %v1414_v46, 5  ;;  %v1428_v28 = vshll.u32 %v1968_v6, 16  ;;  %v1971_v63 = vcombine.low %v1339_v51, %v1353_v18 }
  0x56   : > { %v1390_v30 = vrot.slane %v1389_v56, 4  ;;  %v1420_v22 = vshll.u32 %v2842_v13, 16  ;;  %v1427_v5 = vrot.slane %v1425_v48, 4  ;;  %v1408_v34 = vrot.slane %v1406_v10, 5 }
  0x57   : > { %v1404_v47 = vrot.slane %v1403_v9, 4  ;;  %v1430_v35 = vrot.slane %v1428_v28, 5  ;;  %v1434_v44 = vshll.u32 %v2845_v20, 16  ;;  %v1865_v40 = vcombine.low %v2803_v33, %v2824_v45  ;;  %v1901_v28 = vld [vmem:[%s2480_s11 + $0x40] sm:$0xf] }
  0x58   : > { %2079 = vmatmul.mubr.msk.bf16.vlgmr.msra.gmra.mrb[0].mxu1 %vm335_vm3, %v1863_v62  ;;  %v1417_v12 = vor.u32 %v1416_v27, %v1413_v23  ;;  %v1367_v37 = vsel %vm2519_vm4, %v1362_v61, %v2829_v7  ;;  %v1381_v41 = vsel %vm2519_vm4, %v1376_v14, %v1380_v16  ;;  %v1895_v62 = vld [vmem:[%s2480_s11 + $0x28] sm:$0xf]  ;;  %v1395_v33 = vsel %vm2519_vm4, %v1390_v30, %v1394_v24  ;;  %v1899_v27 = vld [vmem:[%s2480_s11 + $0x38] sm:$0xf] }
  0x59   : > { %2087 = vmatpush3.bf16.msra.mxu1 %v2719_v54  ;;  %2082 = vmatprep.mubr.msk.bf16.mxu1 %vm335_vm3, %v1864_v26  ;;  %v1431_v54 = vor.u32 %v1430_v35, %v1427_v5  ;;  %v1422_v26 = vrot.slane %v1420_v22, 5  ;;  %v1987_v36 = vrot.slane %v1979_v38, 9  ;;  %v1566_v55 = vrot.slane %v2758_v39, 5  ;;  %v2290_v38 = vld [vmem:[%s2480_s11 + $0x28] ss:$8 sps:$4 sm:$0xff]  }
  0x5a   : > { %2123 = vmatmul.mubr.msk.bf16.gmra.mrb[4].mxu0 %vm335_vm3, %v2287_v8  ;;  %2217 = vmatprep.subr.msk.bf16.mxu1 %vm348_vm0, %v2456_v1  ;;  %v1409_v45 = vsel %vm2519_vm4, %v1404_v47, %v1408_v34  ;;  %v1436_v52 = vrot.slane %v1434_v44, 5  ;;  %v1988_v11 = vrot.slane %v1980_v50, 9  ;;  %v1570_v1 = vrot.slane %v2777_v59, 5  ;;  %v1981_v59 = vld [vmem:[%s2480_s11 + $0x20] sm:$0xe] }
  0x5b   : > { %2128 = vmatprep.mubr.msk.bf16.mxu0 %vm335_vm3, %v1971_v63  ;;  %v1418_v6 = vrot.slane %v1417_v12, 4  ;;  %v1432_v7 = vrot.slane %v1431_v54, 4  ;;  %v873_v43 = vshrl.u32 %v1895_v62, 16  ;;  %v876_v58 = vshll.u32 %v1895_v62, 16  ;;  %v2289_v63 = vld [vmem:[%s2480_s11 + $0x18] ss:$8 sps:$4 sm:$0xff]  }
  0x5c   : > { %v1972_v60 = vcombine.low %v1367_v37, %v1381_v41  ;;  %v887_v51 = vshrl.u32 %v1897_v49, 16  ;;  %v890_v61 = vshll.u32 %v1897_v49, 16  ;;  %v1973_v56 = vcombine.low %v1395_v33, %v1409_v45  ;;  %v1983_v44 = vld [vmem:[%s2480_s11 + $0x30] sm:$0xe] }
  0x5d   : > { %v875_v39 = vrot.slane %v873_v43, 4  ;;  %v878_v0 = vrot.slane %v876_v58, 5  ;;  %v1623_v18 = vsel %vm348_vm0, %v2814_v25, 0  ;;  %v1423_v46 = vsel %vm2519_vm4, %v1418_v6, %v1422_v26  ;;  %v1982_v25 = vld [vmem:[%s2480_s11 + $0x28] sm:$0xe] }
  0x5e   : > { %v889_v4 = vrot.slane %v887_v51, 4  ;;  %v892_v10 = vrot.slane %v890_v61, 5  ;;  %v1437_v14 = vsel %vm2519_vm4, %v1432_v7, %v1436_v52  ;;  %v1567_v16 = vsel %vm2630_vm7, %v1987_v36, %v1566_v55  ;;  %v1985_v6 = vld [vmem:[%s2480_s11 + $0x40] sm:$0xe]  ;;  %v1986_v7 = vld [vmem:[%s2480_s11 + $0x48] sm:$0xe] }
  0x5f   : > { %v1571_v23 = vsel %vm2630_vm7, %v1988_v11, %v1570_v1  ;;  %v879_v48 = vor.u32 %v878_v0, %v875_v39  ;;  %v882_v8 = vshll.u32 %v2650_v42, 16  ;;  %v896_v9 = vshll.u32 %v2653_v29, 16  ;;  %v1984_v42 = vld [vmem:[%s2480_s11 + $0x38] sm:$0xe] }
  0x60   : > { %2083 = vmatmul.mubr.msk.bf16.gmra.mrb[4].mxu1 %vm335_vm3, %v1865_v40  ;;  %v893_v24 = vor.u32 %v892_v10, %v889_v4  ;;  %v1989_v30 = vrot.slane %v1981_v59, 9  ;;  %v1574_v22 = vrot.slane %v2785_v2, 5  ;;  %v1974_v5 = vcombine.low %v1423_v46, %v1437_v14 }
  0x61   : > { %2088 = vmatprep.mubr.msk.bf16.mxu1 %vm335_vm3, %v2288_v57  ;;  %v1996_v47 = vcombine.low %v1567_v16, %v1571_v23  ;;  %v1990_v34 = vrot.slane %v1982_v25, 9  ;;  %v1578_v35 = vrot.slane %v2796_v15, 5  ;;  %v901_v40 = vshrl.u32 %v1899_v27, 16  ;;  %v2291_v57 = vld [vmem:[%s2480_s11 + $0x38] ss:$8 sps:$4 sm:$0xff]   ;;  %s1746_s11 = sshll.u32 %s2950_s9, 4  ;;  %s2969_s11 = int_to_ptr.vmem [resolvable:$true] %s1746_s11 }
  0x62   : > { %2129 = vmatmul.mubr.msk.bf16.vlgmr.msra.gmra.mrb[0].mxu0 %vm335_vm3, %v1972_v60  ;;  %v904_v12 = vshll.u32 %v1899_v27, 16  ;;  %v915_v29 = vshrl.u32 %v1901_v28, 16  ;;  %v918_v50 = vshll.u32 %v1901_v28, 16  ;;  %v880_v37 = vrot.slane %v879_v48, 4  ;;  %s2292_s23 = scalar_lea.vmem %s2969_s11, 1024  ;;  %p2299_p1 = scmp.lt.s32.totalorder %s2969_s11, %s2297_s27 }
  0x63   : > { %2137 = vmatpush3.bf16.msra.mxu0 %v1623_v18  ;;  %2132 = vmatprep.mubr.msk.bf16.mxu0 %vm335_vm3, %v1973_v56  ;;  %v884_v41 = vrot.slane %v882_v8, 5  ;;  %v894_v54 = vrot.slane %v893_v24, 4  ;;  %v898_v62 = vrot.slane %v896_v9, 5  ;;  %v1991_v33 = vrot.slane %v1983_v44, 9  ;;  %p2293_p12 = scmp.ne.s32.totalorder %s2969_s11, %s2292_s23  ;;  %p2300_p2 = scmp.lt.s32.totalorder %s2298_s28, %s2292_s23 }
  0x64   : > { %v1582_v26 = vrot.slane %v2807_v17, 5  ;;  %v1992_v2 = vrot.slane %v1984_v42, 9  ;;  %v1586_v36 = vrot.slane %v2817_v21, 5  ;;  %v903_v15 = vrot.slane %v901_v40, 4 }
  0x65   : > { %v906_v55 = vrot.slane %v904_v12, 5  ;;  %v917_v49 = vrot.slane %v915_v29, 4  ;;  %v920_v45 = vrot.slane %v918_v50, 5  ;;  %v910_v52 = vshll.u32 %v2661_v31, 16  ;;  %p2294_p13 = pnand %p2293_p12, %p2435_p4  ;;  %p2301_p3 = por %p2300_p2, %p2299_p1 }
  0x66   : > { %v885_v17 = vsel %vm2519_vm4, %v880_v37, %v884_v41  ;;  %v899_v21 = vsel %vm2519_vm4, %v894_v54, %v898_v62  ;;  %v1579_v11 = vsel %vm2630_vm7, %v1990_v34, %v1578_v35  ;;  %v1583_v1 = vsel %vm2630_vm7, %v1991_v33, %v1582_v26 }
  0x67   : > { %v1587_v31 = vsel %vm2630_vm7, %v1992_v2, %v1586_v36  ;;  %v924_v43 = vshll.u32 %v2683_v19, 16  ;;  %v1906_v58 = vcombine.low %v885_v17, %v899_v21  ;;  %v907_v60 = vor.u32 %v906_v55, %v903_v15  ;;  %p2295_p0 = pneg %p2294_p13 }
  0x68   : > { %2089 = vmatmul.mubr.msk.bf16.vlgmr.msra.gmra.mrb[0].mxu1 %vm335_vm3, %v2289_v63  ;;  %v921_v51 = vor.u32 %v920_v45, %v917_v49  ;;  %v1998_v56 = vcombine.low %v1583_v1, %v1587_v31  ;;  %v1993_v39 = vrot.slane %v1985_v6, 9  ;;  %v1590_v0 = vrot.slane %v2842_v13, 5 }
  0x69   : > { %2147 = vmatpush3.bf16.msra.mxu1 %v2465_v3  ;;  %2092 = vmatprep.mubr.msk.bf16.mxu1 %vm335_vm3, %v2290_v38  ;;  %v1575_v3 = vsel %vm2630_vm7, %v1989_v30, %v1574_v22  ;;  %v1994_v18 = vrot.slane %v1986_v7, 9  ;;  %v1594_v59 = vrot.slane %v2845_v20, 5  ;;  %v912_v4 = vrot.slane %v910_v52, 5  ;;  %p2302_p5 = pnand %p2301_p3, %p2295_p0 }
  0x6a   : > { %2133 = vmatmul.mubr.msk.bf16.gmra.mrb[4].mxu0 %vm335_vm3, %v1974_v5  ;;  %v1997_v61 = vcombine.low %v1575_v3, %v1579_v11  ;;  %v926_v10 = vrot.slane %v924_v43, 5  ;;  %v908_v46 = vrot.slane %v907_v60, 4  ;;  %v922_v19 = vrot.slane %v921_v51, 4 }
  0x6b   : > { %2138 = vmatprep.mubr.msk.bf16.mxu0 %vm335_vm3, %v1996_v47  ;;  %v1591_v13 = vsel %vm2630_vm7, %v1993_v39, %v1590_v0  ;;  %v1595_v20 = vsel %vm2630_vm7, %v1994_v18, %v1594_v59 }
  0x6c   : > { %v913_v14 = vsel %vm2519_vm4, %v908_v46, %v912_v4  ;;  %v927_v16 = vsel %vm2519_vm4, %v922_v19, %v926_v10  ;;  %v1999_v23 = vcombine.low %v1591_v13, %v1595_v20 }
  0x6d   : > { %v1907_v25 = vcombine.low %v913_v14, %v927_v16 }
  0x70   : > { %2093 = vmatmul.mubr.msk.bf16.gmra.mrb[4].mxu1 %vm335_vm3, %v2291_v57 }
  0x71   : > { %2102 = vmatprep.mubr.msk.bf16.mxu1 %vm335_vm3, %v1906_v58 }
  0x72   : > { %2139 = vmatmul.mubr.msk.bf16.vlgmr.msra.gmra.mrb[0].mxu0 %vm335_vm3, %v1997_v61 }
  0x73   : > { %2142 = vmatprep.mubr.msk.bf16.mxu0 %vm335_vm3, %v1998_v56 }
  0x7a   : > { %2143 = vmatmul.mubr.msk.bf16.gmra.mrb[4].mxu0 %vm335_vm3, %v1999_v23 }
  0x7c   : > { %2103 = vmatmul.mubr.msk.bf16.vlgmr.msra.gmra.mrb[4].mxu1 %vm335_vm3, %v1907_v25 }
 0x13b   : > { %v2090_v48 = vpop.f32.mrb[0].mxu1 }
 0x13c   : > { %v761_v8 = vpop.f32.mrb[1].mxu1 }
 0x13d   : > { %v2091_v24 = vpop.f32.mrb[2].mxu1 }
 0x13e   : > { %v764_v9 = vpop.f32.mrb[3].mxu1 }
 0x145   : > { %v2140_v27 = vpop.f32.mrb[0].mxu0 }
 0x146   : > { %v2148_v32 = vadd.f32 %v2140_v27, %v2090_v48  ;;  %v1659_v28 = vpop.f32.mrb[1].mxu0 }
 0x147   : > { %v2149_v63 = vadd.f32 %v1659_v28, %v761_v8  ;;  %v2141_v30 = vpop.f32.mrb[2].mxu0 }
 0x148   : > { %v1707_v22 = vadd.f32 %v2148_v32, %v2004_v53  ;;  %v2150_v5 = vadd.f32 %v2141_v30, %v2091_v24  ;;  %v1662_v47 = vpop.f32.mrb[3].mxu0 }
 0x149   : > { %v1705_v34 = vadd.f32 %v2149_v63, %v2004_v53  ;;  %v2151_v35 = vadd.f32 %v1662_v47, %v764_v9 }
 0x14a   : > { %v1715_v44 = vmax.f32 %v1707_v22, 0.0  ;;  %v1708_v42 = vadd.f32 %v2150_v5, %v2004_v53 }
 0x14b   : > { %v1713_v38 = vmax.f32 %v1705_v34, 0.0  ;;  %v1706_v40 = vadd.f32 %v2151_v35, %v2004_v53 }
 0x14c   : > { %1724 = vst.msk [vmem:[%s2950_s9 + $0x10] sm:$0xff] %vm1721_vm8, %v1715_v44  ;;  %v1716_v12 = vmax.f32 %v1708_v42, 0.0 }
 0x14d   : > { %1722 = vst.msk [vmem:[%s2950_s9] sm:$0xff] %vm1721_vm8, %v1713_v38  ;;  %v1714_v29 = vmax.f32 %v1706_v40, 0.0  ;;  %v2144_v50 = vpop.f32.mrb[4].mxu0 }
 0x14e   : > { %1725 = vst.msk [vmem:[%s2950_s9 + $0x18] sm:$0xff] %vm1721_vm8, %v1716_v12  ;;  %v1675_v37 = vpop.f32.mrb[5].mxu0 }
 0x14f   : > { %1723 = vst.msk [vmem:[%s2950_s9 + $0x8] sm:$0xff] %vm1721_vm8, %v1714_v29  ;;  %v2104_v41 = vpop.f32.mrb[4].mxu1  ;;  %v2145_v54 = vpop.f32.mrb[6].mxu0 }
 0x150   : > { %v2152_v62 = vadd.f32 %v2144_v50, %v2104_v41  ;;  %v1007_v33 = vpop.f32.mrb[5].mxu1  ;;  %v1678_v26 = vpop.f32.mrb[7].mxu0 }
 0x151   : > { %v2153_v2 = vadd.f32 %v1675_v37, %v1007_v33  ;;  %v2105_v36 = vpop.f32.mrb[6].mxu1 }
 0x152   : > { %v1711_v15 = vadd.f32 %v2152_v62, %v2004_v53  ;;  %v2154_v55 = vadd.f32 %v2145_v54, %v2105_v36  ;;  %v1010_v49 = vpop.f32.mrb[7].mxu1 }
 0x153   : > { %v1709_v45 = vadd.f32 %v2153_v2, %v2004_v53  ;;  %v2155_v52 = vadd.f32 %v1678_v26, %v1010_v49 }
 0x154   : > { %v1719_v17 = vmax.f32 %v1711_v15, 0.0  ;;  %v1712_v21 = vadd.f32 %v2154_v55, %v2004_v53 }
 0x155   : > { %v1717_v3 = vmax.f32 %v1709_v45, 0.0  ;;  %v1710_v11 = vadd.f32 %v2155_v52, %v2004_v53 }
 0x156   : > { %1728 = vst.msk [vmem:[%s2950_s9 + $0x30] sm:$0xff] %vm1721_vm8, %v1719_v17  ;;  %v1720_v1 = vmax.f32 %v1712_v21, 0.0 }
 0x157   : > { %1726 = vst.msk [vmem:[%s2950_s9 + $0x20] sm:$0xff] %vm1721_vm8, %v1717_v3  ;;  %v1718_v31 = vmax.f32 %v1710_v11, 0.0 }
 0x158   : > { %1729 = vst.msk [vmem:[%s2950_s9 + $0x38] sm:$0xff] %vm1721_vm8, %v1720_v1 }
 0x159   : > { %1727 = vst.msk [vmem:[%s2950_s9 + $0x28] sm:$0xff] %vm1721_vm8, %v1718_v31 }
 0x15a   : > { %2305 = shalt.err (!%p2302_p5)
}
 0x15b   : > { %s2306_s29 = scalar_lea.hbm %s2967_s21, 1024  ;;  %s2310_s5 = scalar_lea.hbm %s3028_s3, 2048 }
 0x15c   : > { %p2307_p6 = scmp.ne.s32.totalorder %s2967_s21, %s2306_s29  ;;  %p2311_p10 = scmp.lt.u32.totalorder %s2967_s21, %s3028_s3 }
 0x15d   : > { %p2312_p11 = scmp.lt.u32.totalorder %s2310_s5, %s2306_s29  ;;  %p2314_p13 = scmp.lt.u32.totalorder %s2306_s29, %s2967_s21 }
 0x15e   : > { %p2308_p7 = pnand %p2307_p6, %p2435_p4 }
 0x15f   : > { %p2313_p12 = por %p2312_p11, %p2311_p10 }
 0x160   : > { %p2309_p9 = pneg %p2308_p7 }
 0x161   : > { %p2315_p0 = por %p2314_p13, %p2313_p12 }
 0x163   : > { %p2316_p1 = pnand %p2315_p0, %p2309_p9 }
 0x165   : > { %2319 = shalt.err (!%p2316_p1)
}
 0x166   : > { %s2373_s8 = smov 128   ;;  %s2374_s9 = smov 8  }
 0x167   : > { %2223 = dma.vmem_to_hbm [thread:$0]  (%p2435_p4), %s2969_s11, 1024, %s2967_s21, %s2979_s15, %s2373_s8, %s2373_s8, %s2374_s9  }
 0x168 PF: > { %p2229_p2 = scmp.ge.s32.totalorder %s2370_s17, 2  ;;  %s1761_s10 = sand.u32 1, %s2350_s12  }
 0x169   : > { %s1762_s18 = scalar_lea.sflag [#allocation3], %s1761_s10 }
 0x16a   : > { %p2226_p3 = pnand %p2229_p2, %p2442_p8 }
 0x16c   : > { %2345 = dma.done.wait (!%p2226_p3), %s1762_s18, 1024  }
 0x16d   : > { %2347 = vsyncadd (!%p2226_p3), %s1762_s18, 4294966272  ;;  %s16_s17 = sadd.s32 1, %s2370_s17   ;;  %s3035_s12 = smov %s2354_s13 }
 0x16e   : > { %p13_p5 = scmp.ge.s32.totalorder %s16_s17, 4   ;;  %s3036_s13 = smov %s2358_s14 }
 0x16f   : > { %s3037_s14 = smov %s2448_s25  ;;  %s3038_s15 = smov %s2366_s16 }
 0x170   : > { %s3039_s16 = smov %s3041_s20  ;;  %15 = sbr.rel (!%p13_p5) target bundleno = 4 (0x4), region = 78 }
 0x177   :  { %1767 = vsyncpa [#allocation3], 1 }
 0x178   :  { %1769 = vsyncpa [#allocation3 + $0x1], 1 }

</bundles_post_ra>
